<compile_context>
chip_gen: v5e
topology: v5e:2x2
jax: 0.10.0
libtpu: 0.0.40
codegen_flags: <defaults>
</compile_context>

<pallas_src>
import functools

import jax
import jax.numpy as jnp
from jax.experimental import pallas as pl
from jax.experimental.pallas import tpu as pltpu


# ------------------------------ Pallas kernel --------------------------------

def _dmpnn_encode(x, ea, src_col, dst_row, batch_row, logmw, n_graphs,
                  w1, w2, w3, b3, wfc, bfc, *, depth, after_readout):
    """DMPNN encoder for one batched graph, entirely in registers/VMEM.

    x         [N, nf]  node features
    ea        [E, ef]  directed-edge features
    src_col   [E, 1]   int32 source-node id per directed edge
    dst_row   [1, E]   int32 destination-node id per directed edge
    batch_row [1, N]   int32 graph id per node
    logmw     [G, 1]   or None (input_type='nomw')
    """
    f32 = jnp.float32
    n_nodes = x.shape[0]
    n_edges = ea.shape[0]
    hidden = w2.shape[0]

    # One-hot gather/scatter/pool operators built in-register (no HBM traffic,
    # no ExE operand anywhere).
    src_oh = (jax.lax.broadcasted_iota(jnp.int32, (n_edges, n_nodes), 1)
              == src_col).astype(f32)                                  # [E, N]
    scat = (jax.lax.broadcasted_iota(jnp.int32, (n_nodes, n_edges), 0)
            == dst_row).astype(f32)                                    # [N, E]
    pool = (jax.lax.broadcasted_iota(jnp.int32, (n_graphs, n_nodes), 0)
            == batch_row).astype(f32)                                  # [G, N]

    # h0 = ReLU(W1 @ [x[src] || edge_attr])
    x_src = jnp.dot(src_oh, x, preferred_element_type=f32)             # x[src]
    init_msg = jnp.concatenate([x_src, ea], axis=1)                    # [E, nf+ef]
    h0 = jnp.maximum(jnp.dot(init_msg, w1, preferred_element_type=f32), 0.0)
    h = h0

    # Reverse edge == adjacent-pair swap (chemprop layout: rev(e) == e ^ 1),
    # hoisted outside the depth loop.
    # TODO(synk): a general revedge_index would need an explicit in-kernel gather.
    even_row = (jax.lax.broadcasted_iota(jnp.int32, (n_edges, hidden), 0) & 1) == 0
    for _ in range(depth - 1):
        m_node = jnp.dot(scat, h, preferred_element_type=f32)          # [N, H]
        m_all = jnp.dot(src_oh, m_node, preferred_element_type=f32)    # [E, H]
        h_rev = jnp.where(even_row,
                          jnp.roll(h, -1, axis=0),   # h[e+1] for even e
                          jnp.roll(h, 1, axis=0))    # h[e-1] for odd e
        h = jnp.maximum(
            h0 + jnp.dot(m_all - h_rev, w2, preferred_element_type=f32), 0.0)

    # Aggregate incoming messages at nodes, node MLP, mean pool, fc head.
    v_msg = jnp.dot(scat, h, preferred_element_type=f32)               # [N, H]
    z = jnp.concatenate([x, v_msg], axis=1)                            # [N, nf+H]
    node_attr = jnp.maximum(
        jnp.dot(z, w3, preferred_element_type=f32) + b3, 0.0)
    counts = jnp.sum(pool, axis=1, keepdims=True)                      # [G, 1]
    pooled = jnp.dot(pool, node_attr, preferred_element_type=f32) / counts
    if logmw is not None:
        pooled = jnp.concatenate([pooled, logmw], axis=1)              # [G, H+1]
    pre = jnp.dot(pooled, wfc, preferred_element_type=f32) + bfc       # [G, emb]
    if after_readout == "tanh":
        return jnp.tanh(pre)
    # 'norm': F.normalize(pre, dim=1), eps=1e-12, via EUP rsqrt.
    ss = jnp.sum(pre * pre, axis=1, keepdims=True)
    return pre * jax.lax.rsqrt(jnp.maximum(ss, 1e-24))


def molsets_fused_kernel(
    # polymer graph batch
    x_ref, ea_ref, src_ref, dst_ref, batch_ref, logmw_ref, frac_ref,
    # salt graph
    sx_ref, sea_ref, ssrc_ref, sdst_ref, sbatch_ref,
    # scalar (SMEM)
    salt_mol_ref,
    # phi params
    pw1_ref, pw2_ref, pw3_ref, pb3_ref, pwfc_ref, pbfc_ref,
    # phi_salt params
    sw1_ref, sw2_ref, sw3_ref, sb3_ref, swfc_ref, sbfc_ref,
    # head params
    wq_ref, bq_ref, wk_ref, bk_ref, wv_ref, bv_ref,
    wr1_ref, br1_ref, wr2_ref, br2_ref, wr3_ref, br3_ref,
    # output
    out_ref,
    *, depth, after_readout):
    f32 = jnp.float32
    n_graphs = logmw_ref.shape[0]

    # ---- phi: polymer graphs (log10(mw) appended before fc) ----
    emb = _dmpnn_encode(
        x_ref[...], ea_ref[...], src_ref[...], dst_ref[...], batch_ref[...],
        logmw_ref[...], n_graphs,
        pw1_ref[...], pw2_ref[...], pw3_ref[...], pb3_ref[...],
        pwfc_ref[...], pbfc_ref[...],
        depth=depth, after_readout=after_readout)                      # [G, emb]

    # ---- phi_salt: single salt graph (input_type='nomw') ----
    salt_emb = _dmpnn_encode(
        sx_ref[...], sea_ref[...], ssrc_ref[...], sdst_ref[...], sbatch_ref[...],
        None, 1,
        sw1_ref[...], sw2_ref[...], sw3_ref[...], sb3_ref[...],
        swfc_ref[...], sbfc_ref[...],
        depth=depth, after_readout=after_readout)                      # [1, emb]

    # ---- attention set pooling ----
    att_dim = wq_ref.shape[1]
    q = jnp.dot(emb, wq_ref[...], preferred_element_type=f32) + bq_ref[...]
    k = jnp.dot(emb, wk_ref[...], preferred_element_type=f32) + bk_ref[...]
    v = jnp.dot(emb, wv_ref[...], preferred_element_type=f32) + bv_ref[...]
    scores = jnp.dot(q, k.T, preferred_element_type=f32) * (1.0 / att_dim ** 0.5)
    # torch.softmax(att_scores, dim=0): normalise each column over rows.
    scores = scores - jnp.max(scores, axis=0, keepdims=True)
    e = jnp.exp(scores)
    p_att = e * pl.reciprocal(jnp.sum(e, axis=0, keepdims=True), approx=True)
    att_out = jnp.dot(p_att, v, preferred_element_type=f32)            # [G, emb]
    xmix = jnp.dot(frac_ref[...], att_out, preferred_element_type=f32)  # [1, emb]

    # ---- rho MLP on [xmix || salt_emb || salt_mol] ----
    sm = jnp.full((1, 1), salt_mol_ref[0, 0], dtype=f32)
    zcat = jnp.concatenate([xmix, salt_emb, sm], axis=1)               # [1, 2*emb+1]
    h1 = jnp.maximum(
        jnp.dot(zcat, wr1_ref[...], preferred_element_type=f32) + br1_ref[...], 0.0)
    h2 = jnp.maximum(
        jnp.dot(h1, wr2_ref[...], preferred_element_type=f32) + br2_ref[...], 0.0)
    out_ref[...] = (jnp.dot(h2, wr3_ref[...], preferred_element_type=f32)
                    + br3_ref[...])


# ------------------------------- wrappers ------------------------------------

_VMEM = pl.BlockSpec(memory_space=pltpu.MemorySpace.VMEM)
_SMEM = pl.BlockSpec(memory_space=pltpu.MemorySpace.SMEM)


def _graph_kernel_inputs(graph):
    x, ei, rev, ea, batch, _ = graph
    n_nodes = x.shape[0]
    n_edges = ei.shape[1]
    # The kernel swaps adjacent directed-edge pairs for the reverse-edge term
    # (standard chemprop layout). Verify it holds for this batch.
    assert bool(jnp.all(rev == (jnp.arange(n_edges, dtype=rev.dtype) ^ 1))), \
        "kernel assumes rev(e) == e ^ 1 (adjacent directed-edge pairs)"
    src_col = ei[0].reshape(n_edges, 1).astype(jnp.int32)
    dst_row = ei[1].reshape(1, n_edges).astype(jnp.int32)
    batch_row = batch.reshape(1, n_nodes).astype(jnp.int32)
    return (x.astype(jnp.float32), ea.astype(jnp.float32),
            src_col, dst_row, batch_row)


def molsets_dmpnn_forward(params, graphs, mw, frac, salt_mol, salt_graph,
                          depth, after_readout):
    x, ea, src, dst, batch = _graph_kernel_inputs(graphs)
    sx, sea, ssrc, sdst, sbatch = _graph_kernel_inputs(salt_graph)
    n_graphs = graphs[5]
    logmw = jnp.log10(mw).reshape(n_graphs, 1).astype(jnp.float32)
    frac_row = frac.reshape(1, n_graphs).astype(jnp.float32)
    salt_mol_2d = jnp.asarray(salt_mol, jnp.float32).reshape(1, 1)

    p, s, h = params["phi"], params["phi_salt"], params["head"]
    inputs = [
        x, ea, src, dst, batch, logmw, frac_row,
        sx, sea, ssrc, sdst, sbatch,
        salt_mol_2d,
        p["w1"], p["w2"], p["w3"], p["b3"], p["wfc"], p["bfc"],
        s["w1"], s["w2"], s["w3"], s["b3"], s["wfc"], s["bfc"],
        h["wq"], h["bq"], h["wk"], h["bk"], h["wv"], h["bv"],
        h["wr1"], h["br1"], h["wr2"], h["br2"], h["wr3"], h["br3"],
    ]
    in_specs = [_VMEM] * 12 + [_SMEM] + [_VMEM] * 24
    output_dim = h["br3"].shape[1]
    kernel = functools.partial(molsets_fused_kernel, depth=depth,
                               after_readout=after_readout)
    out = pl.pallas_call(
        kernel,
        out_shape=jax.ShapeDtypeStruct((1, output_dim), jnp.float32),
        in_specs=in_specs,
        out_specs=_VMEM,
        compiler_params=pltpu.CompilerParams(vmem_limit_bytes=32 << 20),
    )(*inputs)
    return out[0]


# ------------------------ pure-JAX reference (check) --------------------------

def reference_forward(params, graphs, mw, frac, salt_mol, salt_graph,
                      depth, after_readout):
    def encoder(p, graph, logmw):
        x, ei, rev, ea, batch, n_graphs = graph
        n_nodes = x.shape[0]
        init_msg = jnp.concatenate([x[ei[0]], ea], axis=1).astype(jnp.float32)
        h0 = jax.nn.relu(init_msg @ p["w1"])
        h = h0
        for _ in range(depth - 1):
            m = jax.ops.segment_sum(h, ei[1], num_segments=n_nodes)
            h = jax.nn.relu(h0 + (m[ei[0]] - h[rev]) @ p["w2"])
        v_msg = jax.ops.segment_sum(h, ei[1], num_segments=n_nodes)
        node_attr = jax.nn.relu(
            jnp.concatenate([x, v_msg], axis=1) @ p["w3"] + p["b3"])
        sums = jax.ops.segment_sum(node_attr, batch, num_segments=n_graphs)
        cnts = jax.ops.segment_sum(jnp.ones((n_nodes, 1), jnp.float32), batch,
                                   num_segments=n_graphs)
        pooled = sums / cnts
        if logmw is not None:
            pooled = jnp.concatenate([pooled, logmw], axis=1)
        pre = pooled @ p["wfc"] + p["bfc"]
        if after_readout == "tanh":
            return jnp.tanh(pre)
        nrm = jnp.maximum(jnp.sqrt(jnp.sum(pre * pre, axis=1, keepdims=True)),
                          1e-12)
        return pre / nrm

    logmw = jnp.log10(mw).reshape(-1, 1).astype(jnp.float32)
    emb = encoder(params["phi"], graphs, logmw)
    salt_emb = encoder(params["phi_salt"], salt_graph, None)
    hp = params["head"]
    q = emb @ hp["wq"] + hp["bq"]
    k = emb @ hp["wk"] + hp["bk"]
    v = emb @ hp["wv"] + hp["bv"]
    scores = (q @ k.T) / (k.shape[1] ** 0.5)
    p_att = jax.nn.softmax(scores, axis=0)
    att_out = p_att @ v
    xmix = frac.reshape(1, -1) @ att_out
    zcat = jnp.concatenate(
        [xmix, salt_emb, jnp.asarray(salt_mol, jnp.float32).reshape(1, 1)], axis=1)
    h1 = jax.nn.relu(zcat @ hp["wr1"] + hp["br1"])
    h2 = jax.nn.relu(h1 @ hp["wr2"] + hp["br2"])
    return (h2 @ hp["wr3"] + hp["br3"])[0]


# ------------------------------ data / params ---------------------------------

def make_graph(key, n_nodes, node_fdim, edge_fdim):
    # ring topology; each undirected bond -> two consecutive directed edges.
    src, dst = [], []
    for i in range(n_nodes):
        j = (i + 1) % n_nodes
        src += [i, j]
        dst += [j, i]
    edge_index = jnp.array([src, dst], dtype=jnp.int32)
    num_edges = len(src)
    rev = jnp.array([e ^ 1 for e in range(num_edges)], dtype=jnp.int32)
    k1, k2 = jax.random.split(key)
    x = jax.random.normal(k1, (n_nodes, node_fdim), jnp.float32)
    edge_attr = jax.random.normal(k2, (num_edges, edge_fdim), jnp.float32)
    return x, edge_index, rev, edge_attr


def batch_graphs(keys, n_nodes_list, node_fdim, edge_fdim):
    xs, eis, revs, eas, batch = [], [], [], [], []
    node_off, edge_off = 0, 0
    for g, (key, nn) in enumerate(zip(keys, n_nodes_list)):
        x, ei, rev, ea = make_graph(key, nn, node_fdim, edge_fdim)
        xs.append(x)
        eis.append(ei + node_off)
        revs.append(rev + edge_off)
        eas.append(ea)
        batch.append(jnp.full((nn,), g, jnp.int32))
        node_off += nn
        edge_off += ei.shape[1]
    return (jnp.concatenate(xs, 0), jnp.concatenate(eis, 1),
            jnp.concatenate(revs, 0), jnp.concatenate(eas, 0),
            jnp.concatenate(batch, 0), len(n_nodes_list))


def _dense(key, in_dim, out_dim, scale=0.1):
    return jax.random.normal(key, (in_dim, out_dim), jnp.float32) * scale


def init_params(key, node_fdim, edge_fdim, hidden, emb_dim, output_dim,
                att_dim=16):
    ks = iter(jax.random.split(key, 40))

    def enc(with_mw):
        fc_in = hidden + 1 if with_mw else hidden
        return {
            "w1": _dense(next(ks), node_fdim + edge_fdim, hidden),   # no bias
            "w2": _dense(next(ks), hidden, hidden),                  # no bias
            "w3": _dense(next(ks), node_fdim + hidden, hidden),
            "b3": _dense(next(ks), 1, hidden),
            "wfc": _dense(next(ks), fc_in, emb_dim),
            "bfc": _dense(next(ks), 1, emb_dim),
        }

    head = {
        "wq": _dense(next(ks), emb_dim, att_dim), "bq": _dense(next(ks), 1, att_dim),
        "wk": _dense(next(ks), emb_dim, att_dim), "bk": _dense(next(ks), 1, att_dim),
        "wv": _dense(next(ks), emb_dim, emb_dim), "bv": _dense(next(ks), 1, emb_dim),
        "wr1": _dense(next(ks), 2 * emb_dim + 1, hidden),
        "br1": _dense(next(ks), 1, hidden),
        "wr2": _dense(next(ks), hidden, hidden), "br2": _dense(next(ks), 1, hidden),
        "wr3": _dense(next(ks), hidden, output_dim),
        "br3": _dense(next(ks), 1, output_dim),
    }
    return {"phi": enc(True), "phi_salt": enc(False), "head": head}


# --------------------------------- main ----------------------------------------

if __name__ == "__main__":
    NODE_FDIM = 16     # n_node_features
    EDGE_FDIM = 14     # fixed in the module
    HIDDEN = 32        # hidden_dim
    EMB = 16           # emb_dim
    OUT = 8            # output_dim
    DEPTH = 3          # n_conv_layers
    AFTER_READOUT = "tanh"
    ATT_DIM = 16

    key = jax.random.PRNGKey(0)
    k_params, k_graphs, k_salt, k_misc = jax.random.split(key, 4)

    params = init_params(k_params, NODE_FDIM, EDGE_FDIM, HIDDEN, EMB, OUT, ATT_DIM)

    # 4 polymer graphs of 6 nodes each (batched PyG-style: N=24 nodes, E=48 edges)
    gkeys = jax.random.split(k_graphs, 4)
    graphs = batch_graphs(gkeys, [6, 6, 6, 6], NODE_FDIM, EDGE_FDIM)

    # single salt graph of 5 nodes (N=5, E=10)
    salt_graph = batch_graphs(jax.random.split(k_salt, 1), [5],
                              NODE_FDIM, EDGE_FDIM)

    k_mw, k_frac, k_sm = jax.random.split(k_misc, 3)
    mw = jax.random.uniform(k_mw, (4,), jnp.float32, 50.0, 500.0)
    frac = jax.nn.softmax(jax.random.normal(k_frac, (4,), jnp.float32))
    salt_mol = jax.random.uniform(k_sm, (), jnp.float32, 0.1, 2.0)

    out = molsets_dmpnn_forward(params, graphs, mw, frac, salt_mol, salt_graph,
                                DEPTH, AFTER_READOUT)
    out = jax.block_until_ready(out)
    assert out.shape == (OUT,) and out.dtype == jnp.float32

    ref = reference_forward(params, graphs, mw, frac, salt_mol, salt_graph,
                            DEPTH, AFTER_READOUT)
    ref = jax.block_until_ready(ref)
    assert jnp.allclose(out, ref, rtol=5e-2, atol=2e-2), (out, ref)
    print("KERNEL_OK")
</pallas_src>

<mosaic_0001>
module attributes {stable_mosaic.version = 11 : i64} {
  func.func @molsets_fused_kernel(%arg0: memref<24x16xf32, #tpu.memory_space<vmem>>, %arg1: memref<48x14xf32, #tpu.memory_space<vmem>>, %arg2: memref<48x1xi32, #tpu.memory_space<vmem>>, %arg3: memref<1x48xi32, #tpu.memory_space<vmem>>, %arg4: memref<1x24xi32, #tpu.memory_space<vmem>>, %arg5: memref<4x1xf32, #tpu.memory_space<vmem>>, %arg6: memref<1x4xf32, #tpu.memory_space<vmem>>, %arg7: memref<5x16xf32, #tpu.memory_space<vmem>>, %arg8: memref<10x14xf32, #tpu.memory_space<vmem>>, %arg9: memref<10x1xi32, #tpu.memory_space<vmem>>, %arg10: memref<1x10xi32, #tpu.memory_space<vmem>>, %arg11: memref<1x5xi32, #tpu.memory_space<vmem>>, %arg12: memref<1x1xf32, #tpu.memory_space<smem>>, %arg13: memref<30x32xf32, #tpu.memory_space<vmem>>, %arg14: memref<32x32xf32, #tpu.memory_space<vmem>>, %arg15: memref<48x32xf32, #tpu.memory_space<vmem>>, %arg16: memref<1x32xf32, #tpu.memory_space<vmem>>, %arg17: memref<33x16xf32, #tpu.memory_space<vmem>>, %arg18: memref<1x16xf32, #tpu.memory_space<vmem>>, %arg19: memref<30x32xf32, #tpu.memory_space<vmem>>, %arg20: memref<32x32xf32, #tpu.memory_space<vmem>>, %arg21: memref<48x32xf32, #tpu.memory_space<vmem>>, %arg22: memref<1x32xf32, #tpu.memory_space<vmem>>, %arg23: memref<32x16xf32, #tpu.memory_space<vmem>>, %arg24: memref<1x16xf32, #tpu.memory_space<vmem>>, %arg25: memref<16x16xf32, #tpu.memory_space<vmem>>, %arg26: memref<1x16xf32, #tpu.memory_space<vmem>>, %arg27: memref<16x16xf32, #tpu.memory_space<vmem>>, %arg28: memref<1x16xf32, #tpu.memory_space<vmem>>, %arg29: memref<16x16xf32, #tpu.memory_space<vmem>>, %arg30: memref<1x16xf32, #tpu.memory_space<vmem>>, %arg31: memref<33x32xf32, #tpu.memory_space<vmem>>, %arg32: memref<1x32xf32, #tpu.memory_space<vmem>>, %arg33: memref<32x32xf32, #tpu.memory_space<vmem>>, %arg34: memref<1x32xf32, #tpu.memory_space<vmem>>, %arg35: memref<32x8xf32, #tpu.memory_space<vmem>>, %arg36: memref<1x8xf32, #tpu.memory_space<vmem>>, %arg37: memref<1x8xf32, #tpu.memory_space<vmem>>) attributes {dimension_semantics = [], scalar_prefetch = 0 : i64, scratch_operands = 0 : i64, tpu.core_type = #tpu.core_type<tc>} {
    %c0 = arith.constant 0 : index
    %c0_0 = arith.constant 0 : index
    %0 = vector.load %arg0[%c0, %c0_0] : memref<24x16xf32, #tpu.memory_space<vmem>>, vector<24x16xf32>
    %c0_1 = arith.constant 0 : index
    %c0_2 = arith.constant 0 : index
    %1 = vector.load %arg1[%c0_1, %c0_2] : memref<48x14xf32, #tpu.memory_space<vmem>>, vector<48x14xf32>
    %c0_3 = arith.constant 0 : index
    %c0_4 = arith.constant 0 : index
    %2 = vector.load %arg2[%c0_3, %c0_4] : memref<48x1xi32, #tpu.memory_space<vmem>>, vector<48x1xi32>
    %c0_5 = arith.constant 0 : index
    %c0_6 = arith.constant 0 : index
    %3 = vector.load %arg3[%c0_5, %c0_6] : memref<1x48xi32, #tpu.memory_space<vmem>>, vector<1x48xi32>
    %c0_7 = arith.constant 0 : index
    %c0_8 = arith.constant 0 : index
    %4 = vector.load %arg4[%c0_7, %c0_8] : memref<1x24xi32, #tpu.memory_space<vmem>>, vector<1x24xi32>
    %c0_9 = arith.constant 0 : index
    %c0_10 = arith.constant 0 : index
    %5 = vector.load %arg5[%c0_9, %c0_10] : memref<4x1xf32, #tpu.memory_space<vmem>>, vector<4x1xf32>
    %c0_11 = arith.constant 0 : index
    %c0_12 = arith.constant 0 : index
    %6 = vector.load %arg13[%c0_11, %c0_12] : memref<30x32xf32, #tpu.memory_space<vmem>>, vector<30x32xf32>
    %c0_13 = arith.constant 0 : index
    %c0_14 = arith.constant 0 : index
    %7 = vector.load %arg14[%c0_13, %c0_14] : memref<32x32xf32, #tpu.memory_space<vmem>>, vector<32x32xf32>
    %c0_15 = arith.constant 0 : index
    %c0_16 = arith.constant 0 : index
    %8 = vector.load %arg15[%c0_15, %c0_16] : memref<48x32xf32, #tpu.memory_space<vmem>>, vector<48x32xf32>
    %c0_17 = arith.constant 0 : index
    %c0_18 = arith.constant 0 : index
    %9 = vector.load %arg16[%c0_17, %c0_18] : memref<1x32xf32, #tpu.memory_space<vmem>>, vector<1x32xf32>
    %c0_19 = arith.constant 0 : index
    %c0_20 = arith.constant 0 : index
    %10 = vector.load %arg17[%c0_19, %c0_20] : memref<33x16xf32, #tpu.memory_space<vmem>>, vector<33x16xf32>
    %c0_21 = arith.constant 0 : index
    %c0_22 = arith.constant 0 : index
    %11 = vector.load %arg18[%c0_21, %c0_22] : memref<1x16xf32, #tpu.memory_space<vmem>>, vector<1x16xf32>
    %12 = tpu.iota {dimensions = array<i32: 1>} : vector<48x24xi32>
    %13 = vector.broadcast %2 : vector<48x1xi32> to vector<48x24xi32>
    %14 = arith.cmpi eq, %12, %13 : vector<48x24xi32>
    %15 = arith.extui %14 : vector<48x24xi1> to vector<48x24xi32>
    %16 = arith.sitofp %15 : vector<48x24xi32> to vector<48x24xf32>
    %17 = tpu.iota {dimensions = array<i32: 0>} : vector<24x48xi32>
    %18 = vector.broadcast %3 : vector<1x48xi32> to vector<24x48xi32>
    %19 = arith.cmpi eq, %17, %18 : vector<24x48xi32>
    %20 = arith.extui %19 : vector<24x48xi1> to vector<24x48xi32>
    %21 = arith.sitofp %20 : vector<24x48xi32> to vector<24x48xf32>
    %22 = tpu.iota {dimensions = array<i32: 0>} : vector<4x24xi32>
    %23 = vector.broadcast %4 : vector<1x24xi32> to vector<4x24xi32>
    %24 = arith.cmpi eq, %22, %23 : vector<4x24xi32>
    %25 = arith.extui %24 : vector<4x24xi1> to vector<4x24xi32>
    %26 = arith.sitofp %25 : vector<4x24xi32> to vector<4x24xf32>
    %cst = arith.constant dense<0.000000e+00> : vector<48x16xf32>
    %27 = tpu.matmul %16, %0, %cst {dimension_numbers = #tpu.dot_dimension_numbers<[1], [0], [0], [1], [0, 0, 1, 1], [], []>} : vector<48x24xf32>, vector<24x16xf32>, vector<48x16xf32> -> vector<48x16xf32>
    %28 = tpu.concatenate %27, %1 in 1 : vector<48x16xf32>, vector<48x14xf32> -> vector<48x30xf32>
    %cst_23 = arith.constant dense<0.000000e+00> : vector<48x32xf32>
    %29 = tpu.matmul %28, %6, %cst_23 {dimension_numbers = #tpu.dot_dimension_numbers<[1], [0], [0], [1], [0, 0, 1, 1], [], []>} : vector<48x30xf32>, vector<30x32xf32>, vector<48x32xf32> -> vector<48x32xf32>
    %cst_24 = arith.constant 0.000000e+00 : f32
    %30 = vector.broadcast %cst_24 : f32 to vector<48x32xf32>
    %31 = arith.maximumf %29, %30 : vector<48x32xf32>
    %32 = tpu.iota {dimensions = array<i32: 0>} : vector<48x32xi32>
    %c1_i32 = arith.constant 1 : i32
    %33 = vector.broadcast %c1_i32 : i32 to vector<48x32xi32>
    %34 = arith.andi %32, %33 : vector<48x32xi32>
    %c0_i32 = arith.constant 0 : i32
    %35 = vector.broadcast %c0_i32 : i32 to vector<48x32xi32>
    %36 = arith.cmpi eq, %34, %35 : vector<48x32xi32>
    %cst_25 = arith.constant dense<0.000000e+00> : vector<24x32xf32>
    %37 = tpu.matmul %21, %31, %cst_25 {dimension_numbers = #tpu.dot_dimension_numbers<[1], [0], [0], [1], [0, 0, 1, 1], [], []>} : vector<24x48xf32>, vector<48x32xf32>, vector<24x32xf32> -> vector<24x32xf32>
    %cst_26 = arith.constant dense<0.000000e+00> : vector<48x32xf32>
    %38 = tpu.matmul %16, %37, %cst_26 {dimension_numbers = #tpu.dot_dimension_numbers<[1], [0], [0], [1], [0, 0, 1, 1], [], []>} : vector<48x24xf32>, vector<24x32xf32>, vector<48x32xf32> -> vector<48x32xf32>
    %39 = vector.extract_strided_slice %31 {offsets = [1, 0], sizes = [47, 32], strides = [1, 1]} : vector<48x32xf32> to vector<47x32xf32>
    %40 = vector.extract_strided_slice %31 {offsets = [0, 0], sizes = [1, 32], strides = [1, 1]} : vector<48x32xf32> to vector<1x32xf32>
    %41 = tpu.concatenate %39, %40 in 0 : vector<47x32xf32>, vector<1x32xf32> -> vector<48x32xf32>
    %42 = vector.extract_strided_slice %31 {offsets = [47, 0], sizes = [1, 32], strides = [1, 1]} : vector<48x32xf32> to vector<1x32xf32>
    %43 = vector.extract_strided_slice %31 {offsets = [0, 0], sizes = [47, 32], strides = [1, 1]} : vector<48x32xf32> to vector<47x32xf32>
    %44 = tpu.concatenate %42, %43 in 0 : vector<1x32xf32>, vector<47x32xf32> -> vector<48x32xf32>
    %45 = arith.select %36, %41, %44 : vector<48x32xi1>, vector<48x32xf32>
    %46 = arith.subf %38, %45 : vector<48x32xf32>
    %cst_27 = arith.constant dense<0.000000e+00> : vector<48x32xf32>
    %47 = tpu.matmul %46, %7, %cst_27 {dimension_numbers = #tpu.dot_dimension_numbers<[1], [0], [0], [1], [0, 0, 1, 1], [], []>} : vector<48x32xf32>, vector<32x32xf32>, vector<48x32xf32> -> vector<48x32xf32>
    %48 = arith.addf %31, %47 : vector<48x32xf32>
    %cst_28 = arith.constant 0.000000e+00 : f32
    %49 = vector.broadcast %cst_28 : f32 to vector<48x32xf32>
    %50 = arith.maximumf %48, %49 : vector<48x32xf32>
    %cst_29 = arith.constant dense<0.000000e+00> : vector<24x32xf32>
    %51 = tpu.matmul %21, %50, %cst_29 {dimension_numbers = #tpu.dot_dimension_numbers<[1], [0], [0], [1], [0, 0, 1, 1], [], []>} : vector<24x48xf32>, vector<48x32xf32>, vector<24x32xf32> -> vector<24x32xf32>
    %cst_30 = arith.constant dense<0.000000e+00> : vector<48x32xf32>
    %52 = tpu.matmul %16, %51, %cst_30 {dimension_numbers = #tpu.dot_dimension_numbers<[1], [0], [0], [1], [0, 0, 1, 1], [], []>} : vector<48x24xf32>, vector<24x32xf32>, vector<48x32xf32> -> vector<48x32xf32>
    %53 = vector.extract_strided_slice %50 {offsets = [1, 0], sizes = [47, 32], strides = [1, 1]} : vector<48x32xf32> to vector<47x32xf32>
    %54 = vector.extract_strided_slice %50 {offsets = [0, 0], sizes = [1, 32], strides = [1, 1]} : vector<48x32xf32> to vector<1x32xf32>
    %55 = tpu.concatenate %53, %54 in 0 : vector<47x32xf32>, vector<1x32xf32> -> vector<48x32xf32>
    %56 = vector.extract_strided_slice %50 {offsets = [47, 0], sizes = [1, 32], strides = [1, 1]} : vector<48x32xf32> to vector<1x32xf32>
    %57 = vector.extract_strided_slice %50 {offsets = [0, 0], sizes = [47, 32], strides = [1, 1]} : vector<48x32xf32> to vector<47x32xf32>
    %58 = tpu.concatenate %56, %57 in 0 : vector<1x32xf32>, vector<47x32xf32> -> vector<48x32xf32>
    %59 = arith.select %36, %55, %58 : vector<48x32xi1>, vector<48x32xf32>
    %60 = arith.subf %52, %59 : vector<48x32xf32>
    %cst_31 = arith.constant dense<0.000000e+00> : vector<48x32xf32>
    %61 = tpu.matmul %60, %7, %cst_31 {dimension_numbers = #tpu.dot_dimension_numbers<[1], [0], [0], [1], [0, 0, 1, 1], [], []>} : vector<48x32xf32>, vector<32x32xf32>, vector<48x32xf32> -> vector<48x32xf32>
    %62 = arith.addf %31, %61 : vector<48x32xf32>
    %cst_32 = arith.constant 0.000000e+00 : f32
    %63 = vector.broadcast %cst_32 : f32 to vector<48x32xf32>
    %64 = arith.maximumf %62, %63 : vector<48x32xf32>
    %cst_33 = arith.constant dense<0.000000e+00> : vector<24x32xf32>
    %65 = tpu.matmul %21, %64, %cst_33 {dimension_numbers = #tpu.dot_dimension_numbers<[1], [0], [0], [1], [0, 0, 1, 1], [], []>} : vector<24x48xf32>, vector<48x32xf32>, vector<24x32xf32> -> vector<24x32xf32>
    %66 = tpu.concatenate %0, %65 in 1 : vector<24x16xf32>, vector<24x32xf32> -> vector<24x48xf32>
    %cst_34 = arith.constant dense<0.000000e+00> : vector<24x32xf32>
    %67 = tpu.matmul %66, %8, %cst_34 {dimension_numbers = #tpu.dot_dimension_numbers<[1], [0], [0], [1], [0, 0, 1, 1], [], []>} : vector<24x48xf32>, vector<48x32xf32>, vector<24x32xf32> -> vector<24x32xf32>
    %68 = vector.broadcast %9 : vector<1x32xf32> to vector<24x32xf32>
    %69 = arith.addf %67, %68 : vector<24x32xf32>
    %cst_35 = arith.constant 0.000000e+00 : f32
    %70 = vector.broadcast %cst_35 : f32 to vector<24x32xf32>
    %71 = arith.maximumf %69, %70 : vector<24x32xf32>
    %cst_36 = arith.constant dense<0.000000e+00> : vector<4xf32>
    %72 = vector.multi_reduction <add>, %26, %cst_36 [1] : vector<4x24xf32> to vector<4xf32>
    %73 = vector.shape_cast %72 : vector<4xf32> to vector<4x1xf32>
    %cst_37 = arith.constant dense<0.000000e+00> : vector<4x32xf32>
    %74 = tpu.matmul %26, %71, %cst_37 {dimension_numbers = #tpu.dot_dimension_numbers<[1], [0], [0], [1], [0, 0, 1, 1], [], []>} : vector<4x24xf32>, vector<24x32xf32>, vector<4x32xf32> -> vector<4x32xf32>
    %75 = vector.broadcast %73 : vector<4x1xf32> to vector<4x32xf32>
    %76 = arith.divf %74, %75 : vector<4x32xf32>
    %77 = tpu.concatenate %76, %5 in 1 : vector<4x32xf32>, vector<4x1xf32> -> vector<4x33xf32>
    %cst_38 = arith.constant dense<0.000000e+00> : vector<4x16xf32>
    %78 = tpu.matmul %77, %10, %cst_38 {dimension_numbers = #tpu.dot_dimension_numbers<[1], [0], [0], [1], [0, 0, 1, 1], [], []>} : vector<4x33xf32>, vector<33x16xf32>, vector<4x16xf32> -> vector<4x16xf32>
    %79 = vector.broadcast %11 : vector<1x16xf32> to vector<4x16xf32>
    %80 = arith.addf %78, %79 : vector<4x16xf32>
    %81 = math.tanh %80 : vector<4x16xf32>
    %c0_39 = arith.constant 0 : index
    %c0_40 = arith.constant 0 : index
    %82 = vector.load %arg7[%c0_39, %c0_40] : memref<5x16xf32, #tpu.memory_space<vmem>>, vector<5x16xf32>
    %c0_41 = arith.constant 0 : index
    %c0_42 = arith.constant 0 : index
    %83 = vector.load %arg8[%c0_41, %c0_42] : memref<10x14xf32, #tpu.memory_space<vmem>>, vector<10x14xf32>
    %c0_43 = arith.constant 0 : index
    %c0_44 = arith.constant 0 : index
    %84 = vector.load %arg9[%c0_43, %c0_44] : memref<10x1xi32, #tpu.memory_space<vmem>>, vector<10x1xi32>
    %c0_45 = arith.constant 0 : index
    %c0_46 = arith.constant 0 : index
    %85 = vector.load %arg10[%c0_45, %c0_46] : memref<1x10xi32, #tpu.memory_space<vmem>>, vector<1x10xi32>
    %c0_47 = arith.constant 0 : index
    %c0_48 = arith.constant 0 : index
    %86 = vector.load %arg11[%c0_47, %c0_48] : memref<1x5xi32, #tpu.memory_space<vmem>>, vector<1x5xi32>
    %c0_49 = arith.constant 0 : index
    %c0_50 = arith.constant 0 : index
    %87 = vector.load %arg19[%c0_49, %c0_50] : memref<30x32xf32, #tpu.memory_space<vmem>>, vector<30x32xf32>
    %c0_51 = arith.constant 0 : index
    %c0_52 = arith.constant 0 : index
    %88 = vector.load %arg20[%c0_51, %c0_52] : memref<32x32xf32, #tpu.memory_space<vmem>>, vector<32x32xf32>
    %c0_53 = arith.constant 0 : index
    %c0_54 = arith.constant 0 : index
    %89 = vector.load %arg21[%c0_53, %c0_54] : memref<48x32xf32, #tpu.memory_space<vmem>>, vector<48x32xf32>
    %c0_55 = arith.constant 0 : index
    %c0_56 = arith.constant 0 : index
    %90 = vector.load %arg22[%c0_55, %c0_56] : memref<1x32xf32, #tpu.memory_space<vmem>>, vector<1x32xf32>
    %c0_57 = arith.constant 0 : index
    %c0_58 = arith.constant 0 : index
    %91 = vector.load %arg23[%c0_57, %c0_58] : memref<32x16xf32, #tpu.memory_space<vmem>>, vector<32x16xf32>
    %c0_59 = arith.constant 0 : index
    %c0_60 = arith.constant 0 : index
    %92 = vector.load %arg24[%c0_59, %c0_60] : memref<1x16xf32, #tpu.memory_space<vmem>>, vector<1x16xf32>
    %93 = tpu.iota {dimensions = array<i32: 1>} : vector<10x5xi32>
    %94 = vector.broadcast %84 : vector<10x1xi32> to vector<10x5xi32>
    %95 = arith.cmpi eq, %93, %94 : vector<10x5xi32>
    %96 = arith.extui %95 : vector<10x5xi1> to vector<10x5xi32>
    %97 = arith.sitofp %96 : vector<10x5xi32> to vector<10x5xf32>
    %98 = tpu.iota {dimensions = array<i32: 0>} : vector<5x10xi32>
    %99 = vector.broadcast %85 : vector<1x10xi32> to vector<5x10xi32>
    %100 = arith.cmpi eq, %98, %99 : vector<5x10xi32>
    %101 = arith.extui %100 : vector<5x10xi1> to vector<5x10xi32>
    %102 = arith.sitofp %101 : vector<5x10xi32> to vector<5x10xf32>
    %103 = tpu.iota {dimensions = array<i32: 0>} : vector<1x5xi32>
    %104 = arith.cmpi eq, %103, %86 : vector<1x5xi32>
    %105 = arith.extui %104 : vector<1x5xi1> to vector<1x5xi32>
    %106 = arith.sitofp %105 : vector<1x5xi32> to vector<1x5xf32>
    %cst_61 = arith.constant dense<0.000000e+00> : vector<10x16xf32>
    %107 = tpu.matmul %97, %82, %cst_61 {dimension_numbers = #tpu.dot_dimension_numbers<[1], [0], [0], [1], [0, 0, 1, 1], [], []>} : vector<10x5xf32>, vector<5x16xf32>, vector<10x16xf32> -> vector<10x16xf32>
    %108 = tpu.concatenate %107, %83 in 1 : vector<10x16xf32>, vector<10x14xf32> -> vector<10x30xf32>
    %cst_62 = arith.constant dense<0.000000e+00> : vector<10x32xf32>
    %109 = tpu.matmul %108, %87, %cst_62 {dimension_numbers = #tpu.dot_dimension_numbers<[1], [0], [0], [1], [0, 0, 1, 1], [], []>} : vector<10x30xf32>, vector<30x32xf32>, vector<10x32xf32> -> vector<10x32xf32>
    %cst_63 = arith.constant 0.000000e+00 : f32
    %110 = vector.broadcast %cst_63 : f32 to vector<10x32xf32>
    %111 = arith.maximumf %109, %110 : vector<10x32xf32>
    %112 = tpu.iota {dimensions = array<i32: 0>} : vector<10x32xi32>
    %c1_i32_64 = arith.constant 1 : i32
    %113 = vector.broadcast %c1_i32_64 : i32 to vector<10x32xi32>
    %114 = arith.andi %112, %113 : vector<10x32xi32>
    %c0_i32_65 = arith.constant 0 : i32
    %115 = vector.broadcast %c0_i32_65 : i32 to vector<10x32xi32>
    %116 = arith.cmpi eq, %114, %115 : vector<10x32xi32>
    %cst_66 = arith.constant dense<0.000000e+00> : vector<5x32xf32>
    %117 = tpu.matmul %102, %111, %cst_66 {dimension_numbers = #tpu.dot_dimension_numbers<[1], [0], [0], [1], [0, 0, 1, 1], [], []>} : vector<5x10xf32>, vector<10x32xf32>, vector<5x32xf32> -> vector<5x32xf32>
    %cst_67 = arith.constant dense<0.000000e+00> : vector<10x32xf32>
    %118 = tpu.matmul %97, %117, %cst_67 {dimension_numbers = #tpu.dot_dimension_numbers<[1], [0], [0], [1], [0, 0, 1, 1], [], []>} : vector<10x5xf32>, vector<5x32xf32>, vector<10x32xf32> -> vector<10x32xf32>
    %119 = vector.extract_strided_slice %111 {offsets = [1, 0], sizes = [9, 32], strides = [1, 1]} : vector<10x32xf32> to vector<9x32xf32>
    %120 = vector.extract_strided_slice %111 {offsets = [0, 0], sizes = [1, 32], strides = [1, 1]} : vector<10x32xf32> to vector<1x32xf32>
    %121 = tpu.concatenate %119, %120 in 0 : vector<9x32xf32>, vector<1x32xf32> -> vector<10x32xf32>
    %122 = vector.extract_strided_slice %111 {offsets = [9, 0], sizes = [1, 32], strides = [1, 1]} : vector<10x32xf32> to vector<1x32xf32>
    %123 = vector.extract_strided_slice %111 {offsets = [0, 0], sizes = [9, 32], strides = [1, 1]} : vector<10x32xf32> to vector<9x32xf32>
    %124 = tpu.concatenate %122, %123 in 0 : vector<1x32xf32>, vector<9x32xf32> -> vector<10x32xf32>
    %125 = arith.select %116, %121, %124 : vector<10x32xi1>, vector<10x32xf32>
    %126 = arith.subf %118, %125 : vector<10x32xf32>
    %cst_68 = arith.constant dense<0.000000e+00> : vector<10x32xf32>
    %127 = tpu.matmul %126, %88, %cst_68 {dimension_numbers = #tpu.dot_dimension_numbers<[1], [0], [0], [1], [0, 0, 1, 1], [], []>} : vector<10x32xf32>, vector<32x32xf32>, vector<10x32xf32> -> vector<10x32xf32>
    %128 = arith.addf %111, %127 : vector<10x32xf32>
    %cst_69 = arith.constant 0.000000e+00 : f32
    %129 = vector.broadcast %cst_69 : f32 to vector<10x32xf32>
    %130 = arith.maximumf %128, %129 : vector<10x32xf32>
    %cst_70 = arith.constant dense<0.000000e+00> : vector<5x32xf32>
    %131 = tpu.matmul %102, %130, %cst_70 {dimension_numbers = #tpu.dot_dimension_numbers<[1], [0], [0], [1], [0, 0, 1, 1], [], []>} : vector<5x10xf32>, vector<10x32xf32>, vector<5x32xf32> -> vector<5x32xf32>
    %cst_71 = arith.constant dense<0.000000e+00> : vector<10x32xf32>
    %132 = tpu.matmul %97, %131, %cst_71 {dimension_numbers = #tpu.dot_dimension_numbers<[1], [0], [0], [1], [0, 0, 1, 1], [], []>} : vector<10x5xf32>, vector<5x32xf32>, vector<10x32xf32> -> vector<10x32xf32>
    %133 = vector.extract_strided_slice %130 {offsets = [1, 0], sizes = [9, 32], strides = [1, 1]} : vector<10x32xf32> to vector<9x32xf32>
    %134 = vector.extract_strided_slice %130 {offsets = [0, 0], sizes = [1, 32], strides = [1, 1]} : vector<10x32xf32> to vector<1x32xf32>
    %135 = tpu.concatenate %133, %134 in 0 : vector<9x32xf32>, vector<1x32xf32> -> vector<10x32xf32>
    %136 = vector.extract_strided_slice %130 {offsets = [9, 0], sizes = [1, 32], strides = [1, 1]} : vector<10x32xf32> to vector<1x32xf32>
    %137 = vector.extract_strided_slice %130 {offsets = [0, 0], sizes = [9, 32], strides = [1, 1]} : vector<10x32xf32> to vector<9x32xf32>
    %138 = tpu.concatenate %136, %137 in 0 : vector<1x32xf32>, vector<9x32xf32> -> vector<10x32xf32>
    %139 = arith.select %116, %135, %138 : vector<10x32xi1>, vector<10x32xf32>
    %140 = arith.subf %132, %139 : vector<10x32xf32>
    %cst_72 = arith.constant dense<0.000000e+00> : vector<10x32xf32>
    %141 = tpu.matmul %140, %88, %cst_72 {dimension_numbers = #tpu.dot_dimension_numbers<[1], [0], [0], [1], [0, 0, 1, 1], [], []>} : vector<10x32xf32>, vector<32x32xf32>, vector<10x32xf32> -> vector<10x32xf32>
    %142 = arith.addf %111, %141 : vector<10x32xf32>
    %cst_73 = arith.constant 0.000000e+00 : f32
    %143 = vector.broadcast %cst_73 : f32 to vector<10x32xf32>
    %144 = arith.maximumf %142, %143 : vector<10x32xf32>
    %cst_74 = arith.constant dense<0.000000e+00> : vector<5x32xf32>
    %145 = tpu.matmul %102, %144, %cst_74 {dimension_numbers = #tpu.dot_dimension_numbers<[1], [0], [0], [1], [0, 0, 1, 1], [], []>} : vector<5x10xf32>, vector<10x32xf32>, vector<5x32xf32> -> vector<5x32xf32>
    %146 = tpu.concatenate %82, %145 in 1 : vector<5x16xf32>, vector<5x32xf32> -> vector<5x48xf32>
    %cst_75 = arith.constant dense<0.000000e+00> : vector<5x32xf32>
    %147 = tpu.matmul %146, %89, %cst_75 {dimension_numbers = #tpu.dot_dimension_numbers<[1], [0], [0], [1], [0, 0, 1, 1], [], []>} : vector<5x48xf32>, vector<48x32xf32>, vector<5x32xf32> -> vector<5x32xf32>
    %148 = vector.broadcast %90 : vector<1x32xf32> to vector<5x32xf32>
    %149 = arith.addf %147, %148 : vector<5x32xf32>
    %cst_76 = arith.constant 0.000000e+00 : f32
    %150 = vector.broadcast %cst_76 : f32 to vector<5x32xf32>
    %151 = arith.maximumf %149, %150 : vector<5x32xf32>
    %cst_77 = arith.constant dense<0.000000e+00> : vector<1xf32>
    %152 = vector.multi_reduction <add>, %106, %cst_77 [1] : vector<1x5xf32> to vector<1xf32>
    %153 = vector.shape_cast %152 : vector<1xf32> to vector<1x1xf32>
    %cst_78 = arith.constant dense<0.000000e+00> : vector<1x32xf32>
    %154 = tpu.matmul %106, %151, %cst_78 {dimension_numbers = #tpu.dot_dimension_numbers<[1], [0], [0], [1], [0, 0, 1, 1], [], []>} : vector<1x5xf32>, vector<5x32xf32>, vector<1x32xf32> -> vector<1x32xf32>
    %155 = vector.broadcast %153 : vector<1x1xf32> to vector<1x32xf32>
    %156 = arith.divf %154, %155 : vector<1x32xf32>
    %cst_79 = arith.constant dense<0.000000e+00> : vector<1x16xf32>
    %157 = tpu.matmul %156, %91, %cst_79 {dimension_numbers = #tpu.dot_dimension_numbers<[1], [0], [0], [1], [0, 0, 1, 1], [], []>} : vector<1x32xf32>, vector<32x16xf32>, vector<1x16xf32> -> vector<1x16xf32>
    %158 = arith.addf %157, %92 : vector<1x16xf32>
    %159 = math.tanh %158 : vector<1x16xf32>
    %c0_80 = arith.constant 0 : index
    %c0_81 = arith.constant 0 : index
    %160 = vector.load %arg25[%c0_80, %c0_81] : memref<16x16xf32, #tpu.memory_space<vmem>>, vector<16x16xf32>
    %cst_82 = arith.constant dense<0.000000e+00> : vector<4x16xf32>
    %161 = tpu.matmul %81, %160, %cst_82 {dimension_numbers = #tpu.dot_dimension_numbers<[1], [0], [0], [1], [0, 0, 1, 1], [], []>} : vector<4x16xf32>, vector<16x16xf32>, vector<4x16xf32> -> vector<4x16xf32>
    %c0_83 = arith.constant 0 : index
    %c0_84 = arith.constant 0 : index
    %162 = vector.load %arg26[%c0_83, %c0_84] : memref<1x16xf32, #tpu.memory_space<vmem>>, vector<1x16xf32>
    %163 = vector.broadcast %162 : vector<1x16xf32> to vector<4x16xf32>
    %164 = arith.addf %161, %163 : vector<4x16xf32>
    %c0_85 = arith.constant 0 : index
    %c0_86 = arith.constant 0 : index
    %165 = vector.load %arg27[%c0_85, %c0_86] : memref<16x16xf32, #tpu.memory_space<vmem>>, vector<16x16xf32>
    %cst_87 = arith.constant dense<0.000000e+00> : vector<4x16xf32>
    %166 = tpu.matmul %81, %165, %cst_87 {dimension_numbers = #tpu.dot_dimension_numbers<[1], [0], [0], [1], [0, 0, 1, 1], [], []>} : vector<4x16xf32>, vector<16x16xf32>, vector<4x16xf32> -> vector<4x16xf32>
    %c0_88 = arith.constant 0 : index
    %c0_89 = arith.constant 0 : index
    %167 = vector.load %arg28[%c0_88, %c0_89] : memref<1x16xf32, #tpu.memory_space<vmem>>, vector<1x16xf32>
    %168 = vector.broadcast %167 : vector<1x16xf32> to vector<4x16xf32>
    %169 = arith.addf %166, %168 : vector<4x16xf32>
    %c0_90 = arith.constant 0 : index
    %c0_91 = arith.constant 0 : index
    %170 = vector.load %arg29[%c0_90, %c0_91] : memref<16x16xf32, #tpu.memory_space<vmem>>, vector<16x16xf32>
    %cst_92 = arith.constant dense<0.000000e+00> : vector<4x16xf32>
    %171 = tpu.matmul %81, %170, %cst_92 {dimension_numbers = #tpu.dot_dimension_numbers<[1], [0], [0], [1], [0, 0, 1, 1], [], []>} : vector<4x16xf32>, vector<16x16xf32>, vector<4x16xf32> -> vector<4x16xf32>
    %c0_93 = arith.constant 0 : index
    %c0_94 = arith.constant 0 : index
    %172 = vector.load %arg30[%c0_93, %c0_94] : memref<1x16xf32, #tpu.memory_space<vmem>>, vector<1x16xf32>
    %173 = vector.broadcast %172 : vector<1x16xf32> to vector<4x16xf32>
    %174 = arith.addf %171, %173 : vector<4x16xf32>
    %175 = tpu.transpose %169, [1, 0] : vector<4x16xf32> -> vector<16x4xf32>
    %cst_95 = arith.constant dense<0.000000e+00> : vector<4x4xf32>
    %176 = tpu.matmul %164, %175, %cst_95 {dimension_numbers = #tpu.dot_dimension_numbers<[1], [0], [0], [1], [0, 0, 1, 1], [], []>} : vector<4x16xf32>, vector<16x4xf32>, vector<4x4xf32> -> vector<4x4xf32>
    %cst_96 = arith.constant 2.500000e-01 : f32
    %177 = vector.broadcast %cst_96 : f32 to vector<4x4xf32>
    %178 = arith.mulf %176, %177 : vector<4x4xf32>
    %cst_97 = arith.constant dense<0xFF800000> : vector<4xf32>
    %179 = vector.multi_reduction <maximumf>, %178, %cst_97 [0] : vector<4x4xf32> to vector<4xf32>
    %180 = vector.shape_cast %179 : vector<4xf32> to vector<1x4xf32>
    %181 = vector.broadcast %180 : vector<1x4xf32> to vector<4x4xf32>
    %182 = arith.subf %178, %181 : vector<4x4xf32>
    %183 = math.exp %182 : vector<4x4xf32>
    %cst_98 = arith.constant dense<0.000000e+00> : vector<4xf32>
    %184 = vector.multi_reduction <add>, %183, %cst_98 [0] : vector<4x4xf32> to vector<4xf32>
    %185 = vector.shape_cast %184 : vector<4xf32> to vector<1x4xf32>
    %186 = tpu.reciprocal %185 {approx = true} : vector<1x4xf32> -> vector<1x4xf32>
    %187 = vector.broadcast %186 : vector<1x4xf32> to vector<4x4xf32>
    %188 = arith.mulf %183, %187 : vector<4x4xf32>
    %cst_99 = arith.constant dense<0.000000e+00> : vector<4x16xf32>
    %189 = tpu.matmul %188, %174, %cst_99 {dimension_numbers = #tpu.dot_dimension_numbers<[1], [0], [0], [1], [0, 0, 1, 1], [], []>} : vector<4x4xf32>, vector<4x16xf32>, vector<4x16xf32> -> vector<4x16xf32>
    %c0_100 = arith.constant 0 : index
    %c0_101 = arith.constant 0 : index
    %190 = vector.load %arg6[%c0_100, %c0_101] : memref<1x4xf32, #tpu.memory_space<vmem>>, vector<1x4xf32>
    %cst_102 = arith.constant dense<0.000000e+00> : vector<1x16xf32>
    %191 = tpu.matmul %190, %189, %cst_102 {dimension_numbers = #tpu.dot_dimension_numbers<[1], [0], [0], [1], [0, 0, 1, 1], [], []>} : vector<1x4xf32>, vector<4x16xf32>, vector<1x16xf32> -> vector<1x16xf32>
    %c0_103 = arith.constant 0 : index
    %c0_104 = arith.constant 0 : index
    %192 = memref.load %arg12[%c0_103, %c0_104] : memref<1x1xf32, #tpu.memory_space<smem>>
    %193 = vector.broadcast %192 : f32 to vector<1x1xf32>
    %194 = tpu.concatenate %191, %159, %193 in 1 : vector<1x16xf32>, vector<1x16xf32>, vector<1x1xf32> -> vector<1x33xf32>
    %c0_105 = arith.constant 0 : index
    %c0_106 = arith.constant 0 : index
    %195 = vector.load %arg31[%c0_105, %c0_106] : memref<33x32xf32, #tpu.memory_space<vmem>>, vector<33x32xf32>
    %cst_107 = arith.constant dense<0.000000e+00> : vector<1x32xf32>
    %196 = tpu.matmul %194, %195, %cst_107 {dimension_numbers = #tpu.dot_dimension_numbers<[1], [0], [0], [1], [0, 0, 1, 1], [], []>} : vector<1x33xf32>, vector<33x32xf32>, vector<1x32xf32> -> vector<1x32xf32>
    %c0_108 = arith.constant 0 : index
    %c0_109 = arith.constant 0 : index
    %197 = vector.load %arg32[%c0_108, %c0_109] : memref<1x32xf32, #tpu.memory_space<vmem>>, vector<1x32xf32>
    %198 = arith.addf %196, %197 : vector<1x32xf32>
    %cst_110 = arith.constant 0.000000e+00 : f32
    %199 = vector.broadcast %cst_110 : f32 to vector<1x32xf32>
    %200 = arith.maximumf %198, %199 : vector<1x32xf32>
    %c0_111 = arith.constant 0 : index
    %c0_112 = arith.constant 0 : index
    %201 = vector.load %arg33[%c0_111, %c0_112] : memref<32x32xf32, #tpu.memory_space<vmem>>, vector<32x32xf32>
    %cst_113 = arith.constant dense<0.000000e+00> : vector<1x32xf32>
    %202 = tpu.matmul %200, %201, %cst_113 {dimension_numbers = #tpu.dot_dimension_numbers<[1], [0], [0], [1], [0, 0, 1, 1], [], []>} : vector<1x32xf32>, vector<32x32xf32>, vector<1x32xf32> -> vector<1x32xf32>
    %c0_114 = arith.constant 0 : index
    %c0_115 = arith.constant 0 : index
    %203 = vector.load %arg34[%c0_114, %c0_115] : memref<1x32xf32, #tpu.memory_space<vmem>>, vector<1x32xf32>
    %204 = arith.addf %202, %203 : vector<1x32xf32>
    %cst_116 = arith.constant 0.000000e+00 : f32
    %205 = vector.broadcast %cst_116 : f32 to vector<1x32xf32>
    %206 = arith.maximumf %204, %205 : vector<1x32xf32>
    %c0_117 = arith.constant 0 : index
    %c0_118 = arith.constant 0 : index
    %207 = vector.load %arg35[%c0_117, %c0_118] : memref<32x8xf32, #tpu.memory_space<vmem>>, vector<32x8xf32>
    %cst_119 = arith.constant dense<0.000000e+00> : vector<1x8xf32>
    %208 = tpu.matmul %206, %207, %cst_119 {dimension_numbers = #tpu.dot_dimension_numbers<[1], [0], [0], [1], [0, 0, 1, 1], [], []>} : vector<1x32xf32>, vector<32x8xf32>, vector<1x8xf32> -> vector<1x8xf32>
    %c0_120 = arith.constant 0 : index
    %c0_121 = arith.constant 0 : index
    %209 = vector.load %arg36[%c0_120, %c0_121] : memref<1x8xf32, #tpu.memory_space<vmem>>, vector<1x8xf32>
    %210 = arith.addf %208, %209 : vector<1x8xf32>
    %c0_122 = arith.constant 0 : index
    %c0_123 = arith.constant 0 : index
    %211 = vector.load %arg37[%c0_122, %c0_123] : memref<1x8xf32, #tpu.memory_space<vmem>>, vector<1x8xf32>
    tpu.vector_store %arg37[%c0_122, %c0_123], %210 {strides = array<i32>} : memref<1x8xf32, #tpu.memory_space<vmem>>, vector<1x8xf32>,
    return
  }
}

</mosaic_0001>

<bundles_post_ra>
// kernel: tpu_custom_call.1
= control target key start
LH: loop header
LB: loop body
LE: loop exit
PB: predicated region body
PF: predicated region fallthrough
CT: control target
= control target key end

     0   :  { %s1934_s6 = smov 1   ;;  %s1935_s10 = smov 2   ;;  %s2643_s0 = inlined_call_operand.smem [shape: u32[38], index: -1, kind: input, shape index: {}] }
   0x1   :  { %s1984_s5 = sld [smem:[%s2643_s0]]   ;;  %s1936_s14 = smov 3  }
   0x2   :  { %s1989_s9 = sld [smem:[%s2643_s0 + %s1934_s6]]   ;;  %s1937_s18 = smov 4  }
   0x3   :  { %s1994_s13 = sld [smem:[%s2643_s0 + %s1935_s10]]   ;;  %s1938_s22 = smov 5  }
   0x4   :  { %s1999_s17 = sld [smem:[%s2643_s0 + %s1936_s14]]   ;;  %s1939_s26 = smov 6  }
   0x5   :  { %s2004_s21 = sld [smem:[%s2643_s0 + %s1937_s18]]   ;;  %s1940_s30 = smov 7  }
   0x6   :  { %s2009_s25 = sld [smem:[%s2643_s0 + %s1938_s22]]   ;;  %s1941_s4 = smov 8  }
   0x7   :  { %s2014_s29 = sld [smem:[%s2643_s0 + %s1939_s26]]   ;;  %s1942_s10 = smov 9  }
   0x8   :  { %s2019_s3 = sld [smem:[%s2643_s0 + %s1940_s30]]   ;;  %s1943_s15 = smov 10  }
   0x9   :  { %s2024_s8 = sld [smem:[%s2643_s0 + %s1941_s4]]   ;;  %s1944_s20 = smov 11  }
   0xa   :  { %s2029_s14 = sld [smem:[%s2643_s0 + %s1942_s10]]   ;;  %s1945_s26 = smov 12  }
   0xb   :  { %s2034_s19 = sld [smem:[%s2643_s0 + %s1943_s15]]   ;;  %s1946_s1 = smov 13  }
   0xc   :  { %s2039_s24 = sld [smem:[%s2643_s0 + %s1944_s20]]   ;;  %s1947_s7 = smov 14  }
   0xd   :  { %2653 = sst [smem:[#allocation6_spill]] %s2014_s29  ;;  %s1948_s15 = smov 15  }
   0xe   :  { %s2044_s30 = sld [smem:[%s2643_s0 + %s1945_s26]]   ;;  %s1949_s22 = smov 16  }
   0xf   :  { %s2049_s6 = sld [smem:[%s2643_s0 + %s1946_s1]]   ;;  %s1950_s28 = smov 17  }
  0x10   :  { %s2054_s12 = sld [smem:[%s2643_s0 + %s1947_s7]]   ;;  %s1951_s7 = smov 18  }
  0x11   :  { %2654 = sst [smem:[#allocation7_spill]] %s2034_s19 }
  0x12   :  { %2655 = sst [smem:[#allocation8_spill]] %s2039_s24 }
  0x13   :  { %s2059_s20 = sld [smem:[%s2643_s0 + %s1948_s15]]   ;;  %s1952_s15 = smov 19  }
  0x14   :  { %2656 = sst [smem:[#allocation9_spill]] %s2044_s30 }
  0x15   :  { %s2064_s27 = sld [smem:[%s2643_s0 + %s1949_s22]]   ;;  %s1953_s22 = smov 20  }
  0x16   :  { %s2069_s4 = sld [smem:[%s2643_s0 + %s1950_s28]]   ;;  %s1954_s28 = smov 21  }
  0x17   :  { %s2074_s30 = sld [smem:[%s2643_s0 + %s1951_s7]]   ;;  %s1955_s7 = smov 22  }
  0x18   :  { %s2079_s29 = sld [smem:[%s2643_s0 + %s1952_s15]]   ;;  %s1956_s15 = smov 23  }
  0x19   :  { %s2084_s24 = sld [smem:[%s2643_s0 + %s1953_s22]]   ;;  %s1957_s22 = smov 24  }
  0x1a   :  { %s2099_s19 = sld [smem:[%s2643_s0 + %s1956_s15]]   ;;  %s1960_s15 = smov 27  }
  0x1c   :  { %2657 = sst [smem:[#allocation10_spill]] %s2069_s4 }
  0x1d   :  { %2658 = sst [smem:[#allocation11_spill]] %s2074_s30 }
  0x1e   :  { %s2089_s4 = sld [smem:[%s2643_s0 + %s1954_s28]]   ;;  %s1958_s28 = smov 25  }
  0x1f   :  { %2659 = sst [smem:[#allocation12_spill]] %s2084_s24 }
  0x20   :  { %s2094_s30 = sld [smem:[%s2643_s0 + %s1955_s7]]   ;;  %s1959_s7 = smov 26  }
  0x21   :  { %2662 = sst [smem:[#allocation15_spill]] %s2099_s19 }
  0x22   :  { %s2104_s24 = sld [smem:[%s2643_s0 + %s1957_s22]]   ;;  %s1961_s22 = smov 28  }
  0x23   :  { %s2119_s19 = sld [smem:[%s2643_s0 + %s1960_s15]]   ;;  %s1964_s15 = smov 31  }
  0x24   :  { %2660 = sst [smem:[#allocation13_spill]] %s2089_s4 }
  0x25   :  { %s2109_s4 = sld [smem:[%s2643_s0 + %s1958_s28]]   ;;  %s1962_s28 = smov 29  }
  0x26   :  { %2661 = sst [smem:[#allocation14_spill]] %s2094_s30 }
  0x27   :  { %s2114_s30 = sld [smem:[%s2643_s0 + %s1959_s7]]   ;;  %s1963_s7 = smov 30  }
  0x28   :  { %2663 = sst [smem:[#allocation16_spill]] %s2104_s24 }
  0x29   :  { %2666 = sst [smem:[#allocation19_spill]] %s2119_s19 }
  0x2a   :  { %s2124_s24 = sld [smem:[%s2643_s0 + %s1961_s22]]   ;;  %s1965_s22 = smov 32  }
  0x2b   :  { %2664 = sst [smem:[#allocation17_spill]] %s2109_s4 }
  0x2c   :  { %s2129_s4 = sld [smem:[%s2643_s0 + %s1962_s28]]   ;;  %s1966_s28 = smov 33  }
  0x2d   :  { %2665 = sst [smem:[#allocation18_spill]] %s2114_s30 }
  0x2e   :  { %s2134_s30 = sld [smem:[%s2643_s0 + %s1963_s7]]   ;;  %s1967_s7 = smov 34  }
  0x2f   :  { %s2139_s19 = sld [smem:[%s2643_s0 + %s1964_s15]]   ;;  %s1968_s15 = smov 35  }
  0x30   :  { %2667 = sst [smem:[#allocation20_spill]] %s2124_s24 }
  0x31   :  { %s2144_s24 = sld [smem:[%s2643_s0 + %s1965_s22]]   ;;  %s1969_s22 = smov 36  }
  0x32   :  { %2668 = sst [smem:[#allocation21_spill]] %s2129_s4 }
  0x33   :  { %s2149_s4 = sld [smem:[%s2643_s0 + %s1966_s28]]   ;;  %s1970_s28 = smov 37  }
  0x34   :  { %2669 = sst [smem:[#allocation22_spill]] %s2134_s30 }
  0x35   :  { %2670 = sst [smem:[#allocation23_spill]] %s2139_s19 }
  0x36   :  { %s2154_s30 = sld [smem:[%s2643_s0 + %s1967_s7]]  }
  0x37   :  { %2671 = sst [smem:[#allocation24_spill]] %s2144_s24 }
  0x38   :  { %s2159_s19 = sld [smem:[%s2643_s0 + %s1968_s15]]  }
  0x39   :  { %2672 = sst [smem:[#allocation25_spill]] %s2149_s4 }
  0x3a   :  { %s2164_s24 = sld [smem:[%s2643_s0 + %s1969_s22]]  }
  0x3b   :  { %s2169_s4 = sld [smem:[%s2643_s0 + %s1970_s28]]  }
  0x3c   :  { %v167_v0 = vld [vmem:[%s1994_s13 + $0x10] sm:$0xff]  ;;  %v165_v1 = vld [vmem:[%s1994_s13] sm:$0xff]  ;;  %v1971_v2 = vmov 0   ;;  %v168_v5 = vld [vmem:[%s1994_s13 + $0x18] sm:$0xff] }
  0x3d   :  { %1885 = vset.pattern.permute.xlu1 %v1971_v2  ;;  %1884 = vset.pattern.permute.xlu0 %v1971_v2  ;;  %v169_v3 = vld [vmem:[%s1994_s13 + $0x20] sm:$0xff]  ;;  %v2175_v4 = vld [vmem:[%s1984_s5 + $0x10] sm:$0xff]  ;;  %v166_v6 = vld [vmem:[%s1994_s13 + $0x8] sm:$0xff] }
  0x3e   :  { %204 = vperm.xlu1 %1885, %v167_v0   ;;  %198 = vperm.xlu0 %1884, %v165_v1  }
  0x3f   :  { %1886 = vset.pattern.permute.xlu2 %v1971_v2  ;;  %283 = vmatpush.msra.mxu0 %v2175_v4 }
  0x40   :  { %210 = vperm.xlu2 %1886, %v169_v3  }
  0x41   :  { %81 = vsyncpa [#allocation4], 0  ;;  %v170_v7 = vld [vmem:[%s1994_s13 + $0x28] sm:$0xff]  ;;  %v159_v9 = vld [vmem:[%s1989_s9] sm:$0xff]  ;;  %s1972_s0 = smov 16   ;;  %v195_v16 = vlaneseq  ;;  %vm251_vm0 = vcmask 195584  }
  0x42   :  { %v160_v8 = vld [vmem:[%s1989_s9 + $0x8] sm:$0xff]  ;;  %v163_v10 = vld [vmem:[%s1989_s9 + $0x20] sm:$0xff]  ;;  %v162_v11 = vld [vmem:[%s1989_s9 + $0x18] sm:$0xff]  ;;  %v1973_v19 = vmov 0.0   ;;  %vm355_vm3 = vcmask 1045504   ;;  %vm329_vm8 = vcmask 130048  }
  0x43   :  { %v956_v12 = vld [vmem:[%s2029_s14 + $0x8] sm:$0x3]  ;;  %v955_v13 = vld [vmem:[%s2029_s14] sm:$0xff]  ;;  %v2200_v17 = vand.u32 127, %v195_v16  ;;  %v161_v23 = vld [vmem:[%s1989_s9 + $0x10] sm:$0xff]  ;;  %vm336_vm9 = vcmask 244736  }
  0x44   :  { %v2192_v14 = vld [vmem:[%s1984_s5 + $0x8] sm:$0xff]  ;;  %v2196_v15 = vld [vmem:[%s1984_s5] sm:$0xff]  ;;  %v177_v24 = vld [vmem:[%s2049_s6 + $0x18] sm:$0x3f]  ;;  %v2269_v1 = vshrl.u32 %v195_v16, 7  ;;  %vm415_vm11 = vcmask 392192  }
  0x45   :  { %284 = vmatpush.msra.mxu0 %v2192_v14  ;;  %1753 = vmatpush.msk.msra.mxu1 %vm355_vm3, %v177_v24  ;;  %v176_v26 = vld [vmem:[%s2049_s6 + $0x10] sm:$0xff]  ;;  %v175_v27 = vld [vmem:[%s2049_s6 + $0x8] sm:$0xff]  ;;  %v174_v36 = vld [vmem:[%s2049_s6] sm:$0xff]  ;;  %vm492_vm14 = vcmask 1046528   ;;  %vm514_vm15 = vcmask 1040384   ;;  %s1974_s5 = smov 32  }
  0x46   :  { %207 = vperm.xlu1 %1885, %v168_v5   ;;  %201 = vperm.xlu0 %1884, %v166_v6   ;;  %v164_v29 = vld [vmem:[%s1989_s9 + $0x28] sm:$0xff]  ;;  %v1887_v63 = vld [vmem:[%s1999_s17] ss:$0 sm:$0xff]  ;;  %v181_v16 = vld [vmem:[%s2054_s12 + $0x18] sm:$0xff]  ;;  %v403_v24 = vand.u32 1, %v2269_v1  ;;  %s2685_s9 = sld [smem:[#allocation7_spill]] }
  0x47   :  { %285 = vmatpush.msra.mxu0 %v2196_v15  ;;  %372 = vmatpush.msra.mxu1 %v176_v26  ;;  %vm238_vm10 = vcmp.eq.s32.totalorder %v2269_v1, %v1887_v63  ;;  %s2686_s13 = sld [smem:[#allocation10_spill]]  ;;  %s1975_s23 = smov [#allocation3]  }
  0x48   :  { %213 = vperm.xlu2 %1886, %v170_v7   ;;  %v2282_v6 = vsel %vm238_vm10, 1.0, %v1973_v19  ;;  %v235_v7 = vadd.s32 8, %v2269_v1  ;;  %s2687_s17 = sld [smem:[#allocation12_spill]]  ;;  %s1689_s26 = sshll.u32 %s1975_s23, 4  ;;  %s1690_s26 = int_to_ptr.vmem [resolvable:$true] %s1689_s26 }
  0x49   :  { %373 = vmatpush.msra.mxu1 %v175_v27  ;;  %s2693_s14 = sld [smem:[#allocation17_spill]]  ;;  %s1691_s28 = sshll.u32 %s2169_s4, 4  ;;  %s1692_s28 = int_to_ptr.hbm [resolvable:$true] %s1691_s28 }
  0x4a   :  { %vm239_vm12 = vcmp.eq.s32.totalorder %v235_v7, %v1887_v63  ;;  %s2694_s6 = sld [smem:[#allocation8_spill]]  ;;  %s1924_s1 = scalar_lea.hbm %s2169_s4, 1 }
  0x4b   :  { %374 = vmatpush.msra.mxu1 %v174_v36  ;;  %s2698_s7 = sld [smem:[#allocation22_spill]] }
  0x4c   :  { %s2699_s10 = sld [smem:[#allocation16_spill]] }
  0x4d   :  { %757 = vmatpush.msrb.mxu1 %v181_v16  ;;  %s2700_s11 = sld [smem:[#allocation23_spill]] }
  0x4e   :  { %313 = vrot.lane.b32.xlu1 %v160_v8, %s1972_s0  ;;  %311 = vrot.lane.b32.xlu0 %v159_v9, %s1972_s0  ;;  %v2289_v8 = vsel %vm239_vm12, 1.0, %v1973_v19  ;;  %v236_v9 = vadd.s32 16, %v2269_v1  ;;  %vm1005_vm12 = vcmask 1044480   ;;  %s2701_s15 = sld [smem:[#allocation6_spill]] }
  0x4f   :  { %s2702_s16 = sld [smem:[#allocation25_spill]] }
  0x50   :  { %315 = vrot.lane.b32.xlu2 %v161_v23, %s1972_s0  ;;  %vm240_vm13 = vcmp.eq.s32.totalorder %v236_v9, %v1887_v63  ;;  %v178_v23 = vld [vmem:[%s2054_s12] sm:$0xff]  ;;  %s2703_s18 = sld [smem:[#allocation9_spill]] }
  0x51   :  { %s2704_s22 = sld [smem:[#allocation24_spill]] }
  0x56   :  { %319 = vrot.lane.b32.xlu1 %v163_v10, %s1972_s0  ;;  %317 = vrot.lane.b32.xlu0 %v162_v11, %s1972_s0  ;;  %v2295_v10 = vsel %vm240_vm13, 1.0, %v1973_v19 }
  0x58   :  { %321 = vrot.lane.b32.xlu2 %v164_v29, %s1972_s0 }
  0x5e   :  { %983 = vperm.xlu1 %1885, %v956_v12   ;;  %980 = vperm.xlu0 %1884, %v955_v13  }
  0x9a   :  { %v211_v32 = vpop.permute.xlu2 %210 }
  0x9b   :  { %vm219_vm6 = vcmp.eq.s32.totalorder %v2200_v17, %v211_v32 }
  0x9c   :  { %v2236_v33 = vsel %vm219_vm6, 1.0, %v1973_v19 }
  0xa2   :  { %v214_v34 = vpop.permute.xlu2 %213 }
  0xa3   :  { %vm220_vm7 = vcmp.eq.s32.totalorder %v2200_v17, %v214_v34 }
  0xa4   :  { %v2242_v35 = vsel %vm220_vm7, 1.0, %v1973_v19 }
  0xaa   :  { %v316_v43 = vpop.permute.xlu2 %315 }
  0xb0   :  { %v199_v18 = vpop.permute.xlu0 %198  ;;  %v205_v25 = vpop.permute.xlu1 %204 }
  0xb1   :  { %vm215_vm1 = vcmp.eq.s32.totalorder %v2200_v17, %v199_v18  ;;  %vm217_vm4 = vcmp.eq.s32.totalorder %v2200_v17, %v205_v25  ;;  %v180_v18 = vld [vmem:[%s2054_s12 + $0x10] sm:$0xff] }
  0xb2   :  { %v2204_v20 = vsel %vm215_vm1, 1.0, %v1973_v19  ;;  %v2222_v28 = vsel %vm217_vm4, 1.0, %v1973_v19  ;;  %v322_v52 = vpop.permute.xlu2 %321  ;;  %758 = vmatpush.msrb.mxu1 %v180_v18  ;;  %vm2319_vm1 = vcmp.eq.s32.totalorder %v403_v24, 0 }
  0xb3   :  { %1747 = vmatmul.msk.f32.vlgmr.msra.gmra.mxu0 %vm251_vm0, %v2204_v20 }
  0xb8   :  { %v202_v21 = vpop.permute.xlu0 %201  ;;  %v208_v30 = vpop.permute.xlu1 %207 }
  0xb9   :  { %vm216_vm2 = vcmp.eq.s32.totalorder %v2200_v17, %v202_v21  ;;  %vm218_vm5 = vcmp.eq.s32.totalorder %v2200_v17, %v208_v30  ;;  %v179_v21 = vld [vmem:[%s2054_s12 + $0x8] sm:$0xff]  ;;  %s2695_s12 = sld [smem:[#allocation14_spill]] }
  0xba   :  { %v2210_v22 = vsel %vm216_vm2, 1.0, %v1973_v19  ;;  %v2230_v31 = vsel %vm218_vm5, 1.0, %v1973_v19  ;;  %759 = vmatpush.msrb.mxu1 %v179_v21  ;;  %vm544_vm2 = vcmask 261120  }
  0xbb   :  { %1748 = vmatmul.msk.f32.gmra.mxu0 %vm251_vm0, %v2210_v22 }
  0xbc   :  { %760 = vmatpush.msrb.mxu1 %v178_v23 }
  0xc0   :  { %v312_v37 = vpop.permute.xlu0 %311  ;;  %v314_v40 = vpop.permute.xlu1 %313 }
  0xc3   :  { %1749 = vmatmul.msk.f32.gmra.mxu0 %vm251_vm0, %v2222_v28 }
  0xc8   :  { %v318_v46 = vpop.permute.xlu0 %317  ;;  %v320_v49 = vpop.permute.xlu1 %319 }
  0xcb   :  { %1750 = vmatmul.msk.f32.gmra.mxu0 %vm251_vm0, %v2230_v31 }
  0xd3   :  { %1751 = vmatmul.msk.f32.gmra.mxu0 %vm251_vm0, %v2236_v33 }
  0xdb   :  { %1752 = vmatmul.msk.f32.gmra.mxu0 %vm251_vm0, %v2242_v35 }
 0x130   :  { %v287_v38 = vpop.f32.mrf.mxu0 }
 0x131   :  { %v330_v39 = vsel %vm329_vm8, %v287_v38, %v312_v37 }
 0x132   :  { %1754 = vmatmul.msk.f32.vlgmr.msra.gmra.mxu1 %vm336_vm9, %v330_v39  ;;  %v404_v39 = vand.u32 1, %v235_v7 }
 0x134   :  { %vm2331_vm4 = vcmp.eq.s32.totalorder %v404_v39, 0 }
 0x138   :  { %v290_v41 = vpop.f32.mrf.mxu0 }
 0x139   :  { %v331_v42 = vsel %vm329_vm8, %v290_v41, %v314_v40 }
 0x13a   :  { %1755 = vmatmul.msk.f32.gmra.mxu1 %vm336_vm9, %v331_v42 }
 0x140   :  { %v293_v44 = vpop.f32.mrf.mxu0 }
 0x141   :  { %v332_v45 = vsel %vm329_vm8, %v293_v44, %v316_v43 }
 0x142   :  { %1756 = vmatmul.msk.f32.gmra.mxu1 %vm336_vm9, %v332_v45 }
 0x148   :  { %v296_v47 = vpop.f32.mrf.mxu0 }
 0x149   :  { %v333_v48 = vsel %vm329_vm8, %v296_v47, %v318_v46 }
 0x14a   :  { %1757 = vmatmul.msk.f32.gmra.mxu1 %vm336_vm9, %v333_v48  ;;  %v405_v48 = vand.u32 1, %v236_v9  ;;  %v401_v9 = vadd.s32 32, %v2269_v1 }
 0x14c   :  { %vm2342_vm5 = vcmp.eq.s32.totalorder %v405_v48, 0 }
 0x150   :  { %v299_v50 = vpop.f32.mrf.mxu0 }
 0x151   :  { %v334_v51 = vsel %vm329_vm8, %v299_v50, %v320_v49 }
 0x152   :  { %1758 = vmatmul.msk.f32.gmra.mxu1 %vm336_vm9, %v334_v51 }
 0x158   :  { %v302_v53 = vpop.f32.mrf.mxu0 }
 0x159   :  { %v335_v54 = vsel %vm329_vm8, %v302_v53, %v322_v52  ;;  %v400_v53 = vadd.s32 24, %v2269_v1 }
 0x15a   :  { %1759 = vmatmul.msk.f32.gmra.mxu1 %vm336_vm9, %v335_v54 }
 0x1af   :  { %v376_v55 = vpop.f32.mrf.mxu1 }
 0x1b0   :  { %v2278_v5 = vmax.f32 %v376_v55, 0.0 }
 0x1b2   :  { %v515_v27 = vrot.slane %v2278_v5, 7  ;;  %v493_v30 = vrot.slane %v2278_v5, 1 }
 0x1b7   :  { %v379_v56 = vpop.f32.mrf.mxu1 }
 0x1b8   :  { %v2275_v3 = vmax.f32 %v379_v56, 0.0 }
 0x1ba   :  { %v494_v26 = vrot.slane %v2275_v3, 1  ;;  %v516_v41 = vrot.slane %v2275_v3, 7 }
 0x1bc   :  { %v495_v34 = vsel %vm492_vm14, %v493_v30, %v494_v26  ;;  %v517_v44 = vsel %vm514_vm15, %v515_v27, %v516_v41 }
 0x1bf   :  { %v382_v57 = vpop.f32.mrf.mxu1 }
 0x1c0   :  { %v2271_v2 = vmax.f32 %v382_v57, 0.0 }
 0x1c2   :  { %v496_v40 = vrot.slane %v2271_v2, 1  ;;  %v518_v50 = vrot.slane %v2271_v2, 7 }
 0x1c4   :  { %v497_v43 = vsel %vm492_vm14, %v494_v26, %v496_v40  ;;  %v519_v54 = vsel %vm514_vm15, %v516_v41, %v518_v50 }
 0x1c5   :  { %v533_v46 = vsel %vm2331_vm4, %v497_v43, %v517_v44 }
 0x1c7   :  { %v385_v58 = vpop.f32.mrf.mxu1 }
 0x1c8   :  { %v2265_v0 = vmax.f32 %v385_v58, 0.0  ;;  %v406_v58 = vand.u32 1, %v400_v53 }
 0x1ca   :  { %v498_v49 = vrot.slane %v2265_v0, 1  ;;  %vm2354_vm6 = vcmp.eq.s32.totalorder %v406_v58, 0 }
 0x1cc   :  { %v499_v52 = vsel %vm492_vm14, %v496_v40, %v498_v49 }
 0x1cd   :  { %v534_v56 = vsel %vm2342_vm5, %v499_v52, %v519_v54 }
 0x1cf   :  { %v388_v59 = vpop.f32.mrf.mxu1 }
 0x1d0   :  { %v2261_v62 = vmax.f32 %v388_v59, 0.0 }
 0x1d2   :  { %v500_v59 = vrot.slane %v2261_v62, 1 }
 0x1d4   :  { %v501_v7 = vsel %vm492_vm14, %v498_v49, %v500_v59 }
 0x1d7   :  { %v391_v60 = vpop.f32.mrf.mxu1 }
 0x1d8   :  { %v2259_v61 = vmax.f32 %v391_v60, 0.0  ;;  %v520_v60 = vrot.slane %v2265_v0, 7 }
 0x1da   :  { %435 = vmatpush.msra.mxu2 %v2259_v61  ;;  %v512_v25 = vrot.slane %v2259_v61, 7 }
 0x1dc   :  { %436 = vmatpush.msra.mxu2 %v2261_v62  ;;  %v531_v32 = vsel %vm514_vm15, %v512_v25, %v515_v27  ;;  %v402_v27 = vadd.s32 40, %v2269_v1 }
 0x1dd   :  { %v532_v37 = vsel %vm2319_vm1, %v495_v34, %v531_v32 }
 0x1de   :  { %437 = vmatpush.msra.mxu2 %v2265_v0 }
 0x1e0   :  { %438 = vmatpush.msra.mxu2 %v2271_v2 }
 0x1e2   :  { %439 = vmatpush.msra.mxu2 %v2275_v3 }
 0x1e4   :  { %440 = vmatpush.msra.mxu2 %v2278_v5 }
 0x1e5   :  { %1760 = vmatmul.msk.f32.vlgmr.msra.gmra.mxu2 %vm415_vm11, %v2282_v6 }
 0x1e6   :  { %575 = vmatpush.msrb.mxu2 %v181_v16 }
 0x1e8   :  { %576 = vmatpush.msrb.mxu2 %v180_v18  ;;  %v407_v18 = vand.u32 1, %v401_v9 }
 0x1ea   :  { %577 = vmatpush.msrb.mxu2 %v179_v21  ;;  %v502_v21 = vrot.slane %v2259_v61, 1  ;;  %vm2366_vm7 = vcmp.eq.s32.totalorder %v407_v18, 0 }
 0x1ec   :  { %578 = vmatpush.msrb.mxu2 %v178_v23  ;;  %v522_v23 = vrot.slane %v2261_v62, 7  ;;  %v503_v26 = vsel %vm492_vm14, %v500_v59, %v502_v21  ;;  %v511_v40 = vsel %vm492_vm14, %v502_v21, %v493_v30 }
 0x1ed   :  { %1761 = vmatmul.msk.f32.gmra.mxu2 %vm415_vm11, %v2289_v8 }
 0x1ee   :  { %v523_v32 = vsel %vm514_vm15, %v520_v60, %v522_v23  ;;  %v524_v41 = vsel %vm514_vm15, %v522_v23, %v512_v25 }
 0x1f5   :  { %1762 = vmatmul.msk.f32.gmra.mxu2 %vm415_vm11, %v2295_v10 }
 0x268   :  { %v442_v11 = vpop.f32.mrf.mxu2 }
 0x270   :  { %v445_v12 = vpop.f32.mrf.mxu2 }
 0x278   :  { %v448_v13 = vpop.f32.mrf.mxu2 }
 0x279   :  { %464 = vmatpush.msra.mxu3 %v448_v13 }
 0x27b   :  { %465 = vmatpush.msra.mxu3 %v445_v12 }
 0x27d   :  { %466 = vmatpush.msra.mxu3 %v442_v11  ;;  %v521_v11 = vsel %vm514_vm15, %v518_v50, %v520_v60 }
 0x27e   :  { %1763 = vmatmul.msk.f32.vlgmr.msra.gmra.mxu3 %vm251_vm0, %v2204_v20  ;;  %v535_v13 = vsel %vm2354_vm6, %v501_v7, %v521_v11 }
 0x286   :  { %1764 = vmatmul.msk.f32.gmra.mxu3 %vm251_vm0, %v2210_v22 }
 0x28e   :  { %1765 = vmatmul.msk.f32.gmra.mxu3 %vm251_vm0, %v2222_v28 }
 0x296   :  { %1766 = vmatmul.msk.f32.gmra.mxu3 %vm251_vm0, %v2230_v31 }
 0x29e   :  { %1767 = vmatmul.msk.f32.gmra.mxu3 %vm251_vm0, %v2236_v33 }
 0x2a6   :  { %1768 = vmatmul.msk.f32.gmra.mxu3 %vm251_vm0, %v2242_v35 }
 0x301   :  { %v468_v36 = vpop.f32.mrf.mxu3 }
 0x302   :  { %v538_v38 = vsub.f32 %v468_v36, %v532_v37  ;;  %v536_v36 = vsel %vm2366_vm7, %v503_v26, %v523_v32 }
 0x304   :  { %1769 = vmatmul.msk.f32.vlgmr.msrb.gmra.mxu2 %vm544_vm2, %v538_v38  ;;  %v408_v38 = vand.u32 1, %v402_v27 }
 0x306   :  { %vm2376_vm10 = vcmp.eq.s32.totalorder %v408_v38, 0 }
 0x307   :  { %v537_v44 = vsel %vm2376_vm10, %v511_v40, %v524_v41 }
 0x309   :  { %v471_v45 = vpop.f32.mrf.mxu3 }
 0x30a   :  { %v539_v47 = vsub.f32 %v471_v45, %v533_v46 }
 0x30c   :  { %1770 = vmatmul.msk.f32.gmra.mxu2 %vm544_vm2, %v539_v47 }
 0x311   :  { %v474_v55 = vpop.f32.mrf.mxu3 }
 0x312   :  { %v540_v57 = vsub.f32 %v474_v55, %v534_v56 }
 0x314   :  { %1771 = vmatmul.msk.f32.gmra.mxu2 %vm544_vm2, %v540_v57 }
 0x319   :  { %v477_v12 = vpop.f32.mrf.mxu3 }
 0x31a   :  { %v541_v16 = vsub.f32 %v477_v12, %v535_v13 }
 0x31c   :  { %1772 = vmatmul.msk.f32.gmra.mxu2 %vm544_vm2, %v541_v16 }
 0x321   :  { %v480_v34 = vpop.f32.mrf.mxu3 }
 0x322   :  { %v542_v37 = vsub.f32 %v480_v34, %v536_v36 }
 0x324   :  { %1773 = vmatmul.msk.f32.gmra.mxu2 %vm544_vm2, %v542_v37 }
 0x329   :  { %v483_v43 = vpop.f32.mrf.mxu3 }
 0x32a   :  { %v543_v45 = vsub.f32 %v483_v43, %v537_v44 }
 0x32c   :  { %1774 = vmatmul.msk.f32.gmra.mxu2 %vm544_vm2, %v543_v45 }
 0x387   :  { %v580_v46 = vpop.f32.mrf.mxu2 }
 0x388   :  { %v598_v47 = vadd.f32 %v580_v46, %v2278_v5 }
 0x38a   :  { %v604_v49 = vmax.f32 %v598_v47, 0.0 }
 0x38c   :  { %v677_v53 = vrot.slane %v604_v49, 1  ;;  %v698_v54 = vrot.slane %v604_v49, 7 }
 0x38f   :  { %v583_v48 = vpop.f32.mrf.mxu2 }
 0x390   :  { %v599_v50 = vadd.f32 %v583_v48, %v2275_v3 }
 0x392   :  { %v605_v52 = vmax.f32 %v599_v50, 0.0 }
 0x394   :  { %v678_v30 = vrot.slane %v605_v52, 1  ;;  %v699_v55 = vrot.slane %v605_v52, 7 }
 0x396   :  { %v679_v25 = vsel %vm492_vm14, %v677_v53, %v678_v30  ;;  %v2389_v56 = vsel %vm514_vm15, %v698_v54, %v699_v55 }
 0x397   :  { %v586_v57 = vpop.f32.mrf.mxu2 }
 0x398   :  { %v600_v58 = vadd.f32 %v586_v57, %v2271_v2 }
 0x39a   :  { %v606_v59 = vmax.f32 %v600_v58, 0.0 }
 0x39c   :  { %v680_v60 = vrot.slane %v606_v59, 1  ;;  %v701_v7 = vrot.slane %v606_v59, 7 }
 0x39e   :  { %v681_v9 = vsel %vm492_vm14, %v678_v30, %v680_v60  ;;  %v702_v11 = vsel %vm514_vm15, %v699_v55, %v701_v7 }
 0x39f   :  { %v589_v12 = vpop.f32.mrf.mxu2  ;;  %v716_v13 = vsel %vm2331_vm4, %v681_v9, %v2389_v56  ;;  %v981_v9 = vpop.permute.xlu0 %980 }
 0x3a0   :  { %v601_v16 = vadd.f32 %v589_v12, %v2265_v0  ;;  %vm985_vm13 = vcmp.eq.s32.totalorder %v2200_v17, %v981_v9  ;;  %v984_v12 = vpop.permute.xlu1 %983 }
 0x3a2   :  { %v607_v18 = vmax.f32 %v601_v16, 0.0 }
 0x3a4   :  { %v682_v21 = vrot.slane %v607_v18, 1  ;;  %v703_v23 = vrot.slane %v607_v18, 7 }
 0x3a6   :  { %v683_v26 = vsel %vm492_vm14, %v680_v60, %v682_v21  ;;  %v704_v27 = vsel %vm514_vm15, %v701_v7, %v703_v23 }
 0x3a7   :  { %v592_v32 = vpop.f32.mrf.mxu2  ;;  %v717_v34 = vsel %vm2342_vm5, %v683_v26, %v702_v11  ;;  %vm998_vm5 = vcmask 39936   ;;  %v2449_v11 = vsel %vm985_vm13, 1.0, %v1973_v19  ;;  %vm1076_vm13 = vcmask 80896  }
 0x3a8   :  { %v602_v36 = vadd.f32 %v592_v32, %v2261_v62 }
 0x3aa   :  { %v608_v37 = vmax.f32 %v602_v36, 0.0 }
 0x3ac   :  { %v684_v38 = vrot.slane %v608_v37, 1  ;;  %v705_v40 = vrot.slane %v608_v37, 7 }
 0x3ae   :  { %v685_v41 = vsel %vm492_vm14, %v682_v21, %v684_v38  ;;  %v706_v43 = vsel %vm514_vm15, %v703_v23, %v705_v40 }
 0x3af   :  { %v595_v44 = vpop.f32.mrf.mxu2  ;;  %v718_v45 = vsel %vm2354_vm6, %v685_v41, %v704_v27  ;;  %vm986_vm6 = vcmp.eq.s32.totalorder %v2200_v17, %v984_v12 }
 0x3b0   :  { %v603_v46 = vadd.f32 %v595_v44, %v2259_v61 }
 0x3b2   :  { %v609_v47 = vmax.f32 %v603_v46, 0.0  ;;  %v184_v46 = vld [vmem:[%s2059_s20 + $0x10] sm:$0xff] }
 0x3b4   :  { %v686_v48 = vrot.slane %v609_v47, 1  ;;  %v696_v50 = vrot.slane %v609_v47, 7  ;;  %620 = vmatpush.msrb.mxu0 %v609_v47  ;;  %v183_v47 = vld [vmem:[%s2059_s20 + $0x8] sm:$0xff] }
 0x3b6   :  { %621 = vmatpush.msrb.mxu0 %v608_v37  ;;  %v714_v51 = vsel %vm514_vm15, %v696_v50, %v698_v54  ;;  %v687_v30 = vsel %vm492_vm14, %v684_v38, %v686_v48  ;;  %v695_v55 = vsel %vm492_vm14, %v686_v48, %v677_v53  ;;  %v707_v56 = vsel %vm514_vm15, %v705_v40, %v696_v50  ;;  %v182_v48 = vld [vmem:[%s2059_s20] sm:$0xff] }
 0x3b7   :  { %v715_v57 = vsel %vm2319_vm1, %v679_v25, %v714_v51  ;;  %v719_v63 = vsel %vm2366_vm7, %v687_v30, %v706_v43  ;;  %v720_v58 = vsel %vm2376_vm10, %v695_v55, %v707_v56  ;;  %v962_v30 = vld [vmem:[%s2079_s29 + $0x18] sm:$0x3f]  ;;  %v961_v55 = vld [vmem:[%s2079_s29 + $0x10] sm:$0xff]  ;;  %v960_v56 = vld [vmem:[%s2079_s29 + $0x8] sm:$0xff]  ;;  %vm874_vm7 = vcmask 191488  }
 0x3b8   :  { %622 = vmatpush.msrb.mxu0 %v607_v18 }
 0x3ba   :  { %623 = vmatpush.msrb.mxu0 %v606_v59 }
 0x3bc   :  { %624 = vmatpush.msrb.mxu0 %v605_v52 }
 0x3be   :  { %625 = vmatpush.msrb.mxu0 %v604_v49 }
 0x3bf   :  { %1775 = vmatmul.msk.f32.vlgmr.msrb.gmra.mxu0 %vm415_vm11, %v2282_v6 }
 0x3c7   :  { %1776 = vmatmul.msk.f32.gmra.mxu0 %vm415_vm11, %v2289_v8 }
 0x3cf   :  { %1777 = vmatmul.msk.f32.gmra.mxu0 %vm415_vm11, %v2295_v10 }
 0x43c   :  { %v627_v53 = vpop.f32.mrf.mxu0 }
 0x444   :  { %v630_v54 = vpop.f32.mrf.mxu0 }
 0x44c   :  { %v633_v24 = vpop.f32.mrf.mxu0 }
 0x44d   :  { %649 = vmatpush.msrb.mxu3 %v633_v24 }
 0x44f   :  { %650 = vmatpush.msrb.mxu3 %v630_v54 }
 0x451   :  { %651 = vmatpush.msrb.mxu3 %v627_v53 }
 0x452   :  { %1778 = vmatmul.msk.f32.vlgmr.msrb.gmra.mxu3 %vm251_vm0, %v2204_v20 }
 0x45a   :  { %1779 = vmatmul.msk.f32.gmra.mxu3 %vm251_vm0, %v2210_v22  ;;  %v2439_v22 = vld [vmem:[%s2019_s3] sm:$0x1f]  ;;  %s2691_s3 = sld [smem:[#allocation20_spill]] }
 0x45b   :  { %1803 = vmatpush.msk.msra.mxu1 %vm1005_vm12, %v2439_v22 }
 0x462   :  { %1780 = vmatmul.msk.f32.gmra.mxu3 %vm251_vm0, %v2222_v28 }
 0x46a   :  { %1781 = vmatmul.msk.f32.gmra.mxu3 %vm251_vm0, %v2230_v31 }
 0x472   :  { %1782 = vmatmul.msk.f32.gmra.mxu3 %vm251_vm0, %v2236_v33 }
 0x47a   :  { %1783 = vmatmul.msk.f32.gmra.mxu3 %vm251_vm0, %v2242_v35 }
 0x4d5   :  { %v653_v39 = vpop.f32.mrf.mxu3 }
 0x4d6   :  { %v721_v49 = vsub.f32 %v653_v39, %v715_v57  ;;  %v959_v57 = vld [vmem:[%s2079_s29] sm:$0xff]  ;;  %s2690_s29 = sld [smem:[#allocation15_spill]] }
 0x4d8   :  { %1784 = vmatmul.msk.f32.vlgmr.msrb.gmra.mxu1 %vm544_vm2, %v721_v49 }
 0x4dd   :  { %v656_v20 = vpop.f32.mrf.mxu3 }
 0x4de   :  { %v722_v52 = vsub.f32 %v656_v20, %v716_v13  ;;  %v2455_v13 = vsel %vm986_vm6, 1.0, %v1973_v19 }
 0x4e0   :  { %1785 = vmatmul.msk.f32.gmra.mxu1 %vm544_vm2, %v722_v52  ;;  %v1889_v52 = vld [vmem:[%s2004_s21] ss:$0 sm:$0xff]  ;;  %s2688_s21 = sld [smem:[#allocation19_spill]] }
 0x4e5   :  { %v659_v28 = vpop.f32.mrf.mxu3 }
 0x4e6   :  { %v723_v31 = vsub.f32 %v659_v28, %v717_v34 }
 0x4e8   :  { %1786 = vmatmul.msk.f32.gmra.mxu1 %vm544_vm2, %v723_v31 }
 0x4ed   :  { %v662_v33 = vpop.f32.mrf.mxu3 }
 0x4ee   :  { %v724_v35 = vsub.f32 %v662_v33, %v718_v45  ;;  %v185_v45 = vld [vmem:[%s2059_s20 + $0x18] sm:$0xff]  ;;  %v173_v33 = vld [vmem:[%s2009_s25] sm:$0xf]  ;;  %s2689_s25 = sld [smem:[#allocation11_spill]] }
 0x4f0   :  { %1787 = vmatmul.msk.f32.gmra.mxu1 %vm544_vm2, %v724_v35 }
 0x4f4   :  { %v1891_v42 = vld [vmem:[%s2689_s25] ss:$0 sm:$0xff] }
 0x4f5   :  { %v665_v25 = vpop.f32.mrf.mxu3 }
 0x4f6   :  { %v725_v59 = vsub.f32 %v665_v25, %v719_v63  ;;  %v1888_v25 = vld [vmem:[%s2064_s27] ss:$0 sm:$0xff]  ;;  %s2697_s27 = sld [smem:[#allocation18_spill]] }
 0x4f8   :  { %1788 = vmatmul.msk.f32.gmra.mxu1 %vm544_vm2, %v725_v59 }
 0x4fd   :  { %v668_v60 = vpop.f32.mrf.mxu3 }
 0x4fe   :  { %v726_v7 = vsub.f32 %v668_v60, %v720_v58 }
 0x500   :  { %1789 = vmatmul.msk.f32.gmra.mxu1 %vm544_vm2, %v726_v7 }
 0x508   :  { %1804 = vmatmul.msk.f32.vlgmr.msra.gmra.mxu1 %vm998_vm5, %v2449_v11 }
 0x510   :  { %1805 = vmatmul.msk.f32.gmra.mxu1 %vm998_vm5, %v2455_v13 }
 0x555   :  { %v762_v16 = vpop.f32.mrf.mxu1 }
 0x556   :  { %v780_v43 = vadd.f32 %v762_v16, %v2278_v5  ;;  %v954_v5 = vld [vmem:[%s2024_s8 + $0x8] sm:$0x3] }
 0x55d   :  { %v765_v18 = vpop.f32.mrf.mxu1 }
 0x55e   :  { %v781_v40 = vadd.f32 %v765_v18, %v2275_v3 }
 0x565   :  { %v768_v21 = vpop.f32.mrf.mxu1 }
 0x566   :  { %v782_v17 = vadd.f32 %v768_v21, %v2271_v2  ;;  %v953_v2 = vld [vmem:[%s2024_s8] sm:$0xff]  ;;  %s2692_s8 = sld [smem:[#allocation13_spill]] }
 0x568   :  { %v788_v44 = vmax.f32 %v782_v17, 0.0  ;;  %v191_v17 = vld [vmem:[%s2686_s13 + $0x10] sm:$0xff] }
 0x56d   :  { %v771_v23 = vpop.f32.mrf.mxu1 }
 0x56e   :  { %v783_v36 = vadd.f32 %v771_v23, %v2265_v0  ;;  %v1890_v23 = vld [vmem:[%s2685_s9] ss:$0 sm:$0xff] }
 0x56f   :  { %vm992_vm10 = vcmp.eq.s32.totalorder %v2269_v1, %v1890_v23 }
 0x570   :  { %v789_v41 = vmax.f32 %v783_v36, 0.0  ;;  %v193_v36 = vld [vmem:[%s2686_s13 + $0x20] sm:$0x1] }
 0x571   :  { %1797 = vmatpush.msk.msra.mxu3 %vm514_vm15, %v193_v36 }
 0x575   :  { %v774_v26 = vpop.f32.mrf.mxu1 }
 0x576   :  { %v784_v32 = vadd.f32 %v774_v26, %v2261_v62  ;;  %v787_v62 = vmax.f32 %v781_v40, 0.0 }
 0x578   :  { %v790_v38 = vmax.f32 %v784_v32, 0.0 }
 0x57d   :  { %v777_v27 = vpop.f32.mrf.mxu1 }
 0x57e   :  { %v785_v34 = vadd.f32 %v777_v27, %v2259_v61  ;;  %v786_v61 = vmax.f32 %v780_v43, 0.0 }
 0x580   :  { %v791_v37 = vmax.f32 %v785_v34, 0.0  ;;  %v2517_v34 = vsel %vm992_vm10, 1.0, %v1973_v19  ;;  %vm924_vm10 = vcmask 269312  }
 0x582   :  { %802 = vmatpush.msra.mxu0 %v791_v37  ;;  %v192_v37 = vld [vmem:[%s2686_s13 + $0x18] sm:$0xff] }
 0x583   :  { %943 = vmatpush.msra.mxu3 %v192_v37  ;;  %v1431_v37 = vld [vmem:[%s2688_s21 + $0x8] sm:$0xff] }
 0x584   :  { %803 = vmatpush.msra.mxu0 %v790_v38  ;;  %v190_v38 = vld [vmem:[%s2686_s13 + $0x8] sm:$0xff] }
 0x585   :  { %v1026_v54 = vpop.f32.mrf.mxu1  ;;  %944 = vmatpush.msra.mxu3 %v191_v17  ;;  %v1430_v17 = vld [vmem:[%s2688_s21] sm:$0xff] }
 0x586   :  { %804 = vmatpush.msra.mxu0 %v789_v41  ;;  %v189_v41 = vld [vmem:[%s2686_s13] sm:$0xff] }
 0x587   :  { %945 = vmatpush.msra.mxu3 %v190_v38 }
 0x588   :  { %805 = vmatpush.msra.mxu0 %v788_v44 }
 0x589   :  { %946 = vmatpush.msra.mxu3 %v189_v41 }
 0x58a   :  { %806 = vmatpush.msra.mxu0 %v787_v62 }
 0x58c   :  { %807 = vmatpush.msra.mxu0 %v786_v61 }
 0x58d   :  { %1790 = vmatmul.msk.f32.vlgmr.msra.gmra.mxu0 %vm415_vm11, %v2282_v6  ;;  %v1029_v20 = vpop.f32.mrf.mxu1 }
 0x595   :  { %1791 = vmatmul.msk.f32.gmra.mxu0 %vm415_vm11, %v2289_v8  ;;  %v187_v8 = vld [vmem:[%s2059_s20 + $0x28] sm:$0xff] }
 0x596   :  { %855 = vmatpush.msra.mxu2 %v187_v8 }
 0x59d   :  { %1792 = vmatmul.msk.f32.gmra.mxu0 %vm415_vm11, %v2295_v10  ;;  %v186_v10 = vld [vmem:[%s2059_s20 + $0x20] sm:$0xff]  ;;  %s2696_s20 = sld [smem:[#allocation21_spill]] }
 0x59e   :  { %856 = vmatpush.msra.mxu2 %v186_v10 }
 0x5a0   :  { %857 = vmatpush.msra.mxu2 %v185_v45 }
 0x5a2   :  { %858 = vmatpush.msra.mxu2 %v184_v46 }
 0x5a4   :  { %859 = vmatpush.msra.mxu2 %v183_v47 }
 0x5a6   :  { %860 = vmatpush.msra.mxu2 %v182_v48 }
 0x5a8   :  { %1806 = vmatpush.msk.msrb.mxu2 %vm355_vm3, %v962_v30  ;;  %vm248_vm3 = vcmp.eq.s32.totalorder %v2269_v1, %v1889_v52  ;;  %v964_v30 = vld [vmem:[%s2687_s17 + $0x8] sm:$0xff] }
 0x5aa   :  { %1064 = vmatpush.msrb.mxu2 %v961_v55  ;;  %v963_v55 = vld [vmem:[%s2687_s17] sm:$0xff] }
 0x5ac   :  { %1065 = vmatpush.msrb.mxu2 %v960_v56 }
 0x5ae   :  { %1066 = vmatpush.msrb.mxu2 %v959_v57 }
 0x60a   :  { %v809_v0 = vpop.f32.mrf.mxu0 }
 0x60b   :  { %821 = vrot.lane.b32.xlu2 %v809_v0, %s1972_s0 }
 0x612   :  { %v812_v3 = vpop.f32.mrf.mxu0 }
 0x613   :  { %1034 = vrot.lane.b32.xlu2 %v953_v2, %s1972_s0  ;;  %823 = vrot.lane.b32.xlu0 %v812_v3, %s1972_s0 }
 0x61a   :  { %v815_v6 = vpop.f32.mrf.mxu0 }
 0x61b   :  { %1036 = vrot.lane.b32.xlu0 %v954_v5, %s1972_s0  ;;  %825 = vrot.lane.b32.xlu1 %v815_v6, %s1972_s0 }
 0x61c   :  { %917 = vrot.lane.b32.xlu2 %v173_v33, %s1974_s5 }
 0x665   :  { %v822_v50 = vpop.permute.xlu2 %821 }
 0x666   :  { %v830_v51 = vsel %vm329_vm8, %v2196_v15, %v822_v50  ;;  %v966_v50 = vld [vmem:[%s2687_s17 + $0x18] sm:$0xff] }
 0x667   :  { %1793 = vmatmul.msk.f32.vlgmr.msra.gmra.mxu2 %vm415_vm11, %v830_v51  ;;  %v965_v51 = vld [vmem:[%s2687_s17 + $0x10] sm:$0xff] }
 0x66d   :  { %v1035_v24 = vpop.permute.xlu2 %1034 }
 0x66e   :  { %v1040_v39 = vsel %vm329_vm8, %v1026_v54, %v1035_v24 }
 0x676   :  { %v918_v45 = vpop.permute.xlu2 %917 }
 0x685   :  { %v824_v63 = vpop.permute.xlu0 %823 }
 0x686   :  { %v831_v58 = vsel %vm329_vm8, %v2192_v14, %v824_v63 }
 0x687   :  { %1794 = vmatmul.msk.f32.gmra.mxu2 %vm415_vm11, %v831_v58 }
 0x68d   :  { %v826_v53 = vpop.permute.xlu1 %825  ;;  %v1037_v49 = vpop.permute.xlu0 %1036 }
 0x68e   :  { %v832_v15 = vsel %vm329_vm8, %v2175_v4, %v826_v53  ;;  %v1041_v14 = vsel %vm329_vm8, %v1029_v20, %v1037_v49  ;;  %v1746_v4 = vsel %vm248_vm3, 1.0, %v1973_v19 }
 0x68f   :  { %1795 = vmatmul.msk.f32.gmra.mxu2 %vm415_vm11, %v832_v15  ;;  %v875_v28 = vsel %vm874_vm7, %v1746_v4, 0.0 }
 0x690   :  { %876 = vadd.xlane.f32.xlu1 %v875_v28 }
 0x697   :  { %1807 = vmatmul.msk.f32.vlgmr.msrb.gmra.mxu2 %vm336_vm9, %v1040_v39 }
 0x69f   :  { %1808 = vmatmul.msk.f32.gmra.mxu2 %vm336_vm9, %v1041_v14  ;;  %vm1080_vm9 = vcmask 1041408  }
 0x6ea   :  { %v862_v31 = vpop.f32.mrf.mxu2 }
 0x6eb   :  { %v863_v9 = vadd.f32 %v1888_v25, %v862_v31 }
 0x6ed   :  { %v871_v18 = vmax.f32 %v863_v9, 0.0 }
 0x703   :  { %v877_v40 = vpop.xlane.xlu1 %876 }
 0x704   :  { %1896 = vrcp.f32 %v877_v40  ;;  %v912_v0 = vand.u32 2147483648, %v877_v40  ;;  %v910_v3 = vand.u32 2147483647, %v877_v40 }
 0x706   :  { %v913_v5 = vor.u32 1.1754944e-38, %v912_v0  ;;  %vm911_vm7 = vcmp.eq.f32.partialorder %v910_v3, 8.507059e+37 }
 0x70a   :  { %v865_v35 = vpop.f32.mrf.mxu2  ;;  %v1897_v43 = vpop.eup %1896 }
 0x70b   :  { %v866_v60 = vadd.f32 %v1888_v25, %v865_v35  ;;  %v902_v44 = vmul.f32 %v1897_v43, %v877_v40  ;;  %vm907_vm6 = vweird.f32 %v1897_v43 }
 0x70d   :  { %v872_v16 = vmax.f32 %v866_v60, 0.0  ;;  %v903_v62 = vsub.f32 1.0, %v902_v44  ;;  %v976_v44 = vld [vmem:[%s2690_s29 + $0x10] sm:$0xff] }
 0x70f   :  { %v904_v61 = vmul.f32 %v1897_v43, %v903_v62  ;;  %v975_v62 = vld [vmem:[%s2690_s29 + $0x8] sm:$0xff] }
 0x711   :  { %v905_v2 = vadd.f32 %v1897_v43, %v904_v61  ;;  %v974_v61 = vld [vmem:[%s2690_s29] sm:$0xff] }
 0x712   :  { %v868_v59 = vpop.f32.mrf.mxu2 }
 0x713   :  { %v869_v7 = vadd.f32 %v1888_v25, %v868_v59 }
 0x715   :  { %v873_v12 = vmax.f32 %v869_v7, 0.0 }
 0x717   :  { %894 = vmatpush.msrb.mxu0 %v873_v12 }
 0x719   :  { %895 = vmatpush.msrb.mxu0 %v872_v16 }
 0x71a   :  { %v1068_v21 = vpop.f32.mrf.mxu2 }
 0x71b   :  { %896 = vmatpush.msrb.mxu0 %v871_v18  ;;  %v2512_v32 = vmax.f32 %v1068_v21, 0.0 }
 0x71c   :  { %1796 = vmatmul.msk.f32.vlgmr.msrb.gmra.mxu0 %vm251_vm0, %v1746_v4  ;;  %vm906_vm0 = vweird.f32 %v877_v40 }
 0x71d   :  { %vm908_vm3 = vmor %vm906_vm0, %vm907_vm6  ;;  %v1131_v63 = vrot.slane %v2512_v32, 1  ;;  %v1136_v58 = vrot.slane %v2512_v32, 7  ;;  %vm1529_vm0 = vcmask 31744  }
 0x71e   :  { %v909_v6 = vsel %vm908_vm3, %v1897_v43, %v905_v2 }
 0x71f   :  { %v914_v10 = vsel %vm911_vm7, %v913_v5, %v909_v6 }
 0x722   :  { %v1071_v26 = vpop.f32.mrf.mxu2 }
 0x723   :  { %v2510_v27 = vmax.f32 %v1071_v26, 0.0 }
 0x725   :  { %1809 = vmatpush.msk.msra.mxu0 %vm1080_vm9, %v2510_v27  ;;  %v1132_v57 = vrot.slane %v2510_v27, 1  ;;  %v1139_v49 = vrot.slane %v2510_v27, 7 }
 0x727   :  { %1099 = vmatpush.msra.mxu0 %v2512_v32  ;;  %v1133_v53 = vsel %vm492_vm14, %v1131_v63, %v1132_v57  ;;  %v1138_v15 = vsel %vm514_vm15, %v1132_v57, %v1136_v58  ;;  %v1140_v20 = vsel %vm514_vm15, %v1136_v58, %v1139_v49  ;;  %v1457_v49 = vld [vmem:[%s2696_s20 + $0x8] sm:$0xff] }
 0x728   :  { %1810 = vmatmul.msk.f32.vlgmr.msra.gmra.mxu0 %vm1076_vm13, %v2517_v34  ;;  %v1142_v24 = vsel %vm2319_vm1, %v1133_v53, %v1138_v15  ;;  %v1143_v52 = vsel %vm2331_vm4, %v1138_v15, %v1140_v20  ;;  %v1893_v15 = vld [vmem:[%s2695_s12] ss:$0 sm:$0xff] }
 0x729   :  { %1164 = vmatpush.msrb.mxu0 %v966_v50 }
 0x72b   :  { %1165 = vmatpush.msrb.mxu0 %v965_v51 }
 0x72d   :  { %1166 = vmatpush.msrb.mxu0 %v964_v30 }
 0x72f   :  { %1167 = vmatpush.msrb.mxu0 %v963_v55 }
 0x799   :  { %v898_v8 = vpop.f32.mrf.mxu0 }
 0x79a   :  { %v915_v46 = vmul.f32 %v914_v10, %v898_v8  ;;  %v1892_v10 = vld [vmem:[%s2691_s3] ss:$0 sm:$0xff] }
 0x79c   :  { %v920_v47 = vsel %vm544_vm2, %v915_v46, %v918_v45 }
 0x79d   :  { %1798 = vmatmul.msk.f32.vlgmr.msra.gmra.mxu3 %vm924_vm10, %v920_v47  ;;  %v971_v47 = vld [vmem:[%s2692_s8 + $0x20] sm:$0xff] }
 0x7a5   :  { %v1101_v48 = vpop.f32.mrf.mxu0 }
 0x7a6   :  { %1811 = vmatpush.msk.msrb.mxu3 %vm1005_vm12, %v1101_v48  ;;  %v969_v48 = vld [vmem:[%s2692_s8 + $0x10] sm:$0xff] }
 0x7a7   :  { %1812 = vmatmul.msk.f32.vlgmr.msrb.gmra.mxu3 %vm998_vm5, %v2449_v11 }
 0x7a8   :  { %1262 = vmatpush.msra.mxu3 %v966_v50  ;;  %v968_v50 = vld [vmem:[%s2692_s8 + $0x8] sm:$0xff] }
 0x7aa   :  { %1263 = vmatpush.msra.mxu3 %v965_v51 }
 0x7ac   :  { %1264 = vmatpush.msra.mxu3 %v964_v30  ;;  %v1402_v30 = vld [vmem:[%s2693_s14 + $0x8] sm:$0xff] }
 0x7ae   :  { %1265 = vmatpush.msra.mxu3 %v963_v55  ;;  %v1401_v55 = vld [vmem:[%s2693_s14] sm:$0xff] }
 0x7af   :  { %1813 = vmatmul.msk.f32.gmra.mxu3 %vm998_vm5, %v2455_v13 }
 0x7b0   :  { %1450 = vmatpush.msrb.mxu3 %v1431_v37 }
 0x7b2   :  { %1451 = vmatpush.msrb.mxu3 %v1430_v17 }
 0x820   :  { %v948_v56 = vpop.f32.mrf.mxu3 }
 0x821   :  { %v949_v40 = vadd.f32 %v1891_v42, %v948_v56  ;;  %v958_v56 = vld [vmem:[%s2694_s6] sm:$0x1] }
 0x823   :  { %1898 = vtanh.f32 %v949_v40 }
 0x82a   :  { %v1124_v54 = vpop.f32.mrf.mxu3 }
 0x82b   :  { %v1144_v39 = vsub.f32 %v1124_v54, %v1142_v24 }
 0x82d   :  { %1814 = vmatmul.msk.f32.vlgmr.msrb.gmra.mxu0 %vm544_vm2, %v1144_v39 }
 0x832   :  { %v1127_v14 = vpop.f32.mrf.mxu3 }
 0x833   :  { %v1145_v4 = vsub.f32 %v1127_v14, %v1143_v52 }
 0x835   :  { %1815 = vmatmul.msk.f32.gmra.mxu0 %vm544_vm2, %v1145_v4 }
 0x8aa   :  { %v1169_v28 = vpop.f32.mrf.mxu0 }
 0x8ab   :  { %v1175_v31 = vadd.f32 %v1169_v28, %v2512_v32 }
 0x8ad   :  { %v1177_v35 = vmax.f32 %v1175_v31, 0.0 }
 0x8af   :  { %v1229_v60 = vrot.slane %v1177_v35, 1  ;;  %v1234_v7 = vrot.slane %v1177_v35, 7 }
 0x8b2   :  { %v1172_v33 = vpop.f32.mrf.mxu0 }
 0x8b3   :  { %v1176_v25 = vadd.f32 %v1172_v33, %v2510_v27 }
 0x8b5   :  { %v1178_v59 = vmax.f32 %v1176_v25, 0.0 }
 0x8b7   :  { %v1230_v9 = vrot.slane %v1178_v59, 1  ;;  %v1237_v12 = vrot.slane %v1178_v59, 7  ;;  %1816 = vmatpush.msk.msrb.mxu1 %vm1080_vm9, %v1178_v59 }
 0x8b9   :  { %1197 = vmatpush.msrb.mxu1 %v1177_v35  ;;  %v1231_v16 = vsel %vm492_vm14, %v1229_v60, %v1230_v9  ;;  %v1236_v18 = vsel %vm514_vm15, %v1230_v9, %v1234_v7  ;;  %v1238_v21 = vsel %vm514_vm15, %v1234_v7, %v1237_v12  ;;  %vm1332_vm14 = vcmask 32768   ;;  %v1894_v7 = vld [vmem:[%s2697_s27] ss:$0 sm:$0xff] }
 0x8ba   :  { %1817 = vmatmul.msk.f32.vlgmr.msrb.gmra.mxu1 %vm1076_vm13, %v2517_v34  ;;  %v1240_v23 = vsel %vm2319_vm1, %v1231_v16, %v1236_v18  ;;  %v1241_v26 = vsel %vm2331_vm4, %v1236_v18, %v1238_v21  ;;  %vm995_vm1 = vcmp.eq.s32.totalorder %v2269_v1, %v958_v56  ;;  %v1895_v9 = vld [vmem:[%s2698_s7] ss:$0 sm:$0xff] }
 0x8bb   :  { %v1802_v57 = vsel %vm995_vm1, 1.0, %v1973_v19  ;;  %v1456_v19 = vld [vmem:[%s2696_s20] sm:$0xff] }
 0x8bc   :  { %v1333_v63 = vsel %vm1332_vm14, %v1802_v57, 0.0 }
 0x8bd   :  { %1334 = vadd.xlane.f32.xlu2 %v1333_v63 }
 0x930   :  { %v1335_v1 = vpop.xlane.xlu2 %1334 }
 0x931   :  { %1900 = vrcp.f32 %v1335_v1  ;;  %v1373_v4 = vand.u32 2147483648, %v1335_v1  ;;  %v1371_v31 = vand.u32 2147483647, %v1335_v1 }
 0x933   :  { %v1374_v33 = vor.u32 1.1754944e-38, %v1373_v4 }
 0x937   :  { %v1199_v36 = vpop.f32.mrf.mxu1 }
 0x938   :  { %1818 = vmatpush.msk.msra.mxu2 %vm1005_vm12, %v1199_v36 }
 0x939   :  { %1819 = vmatmul.msk.f32.vlgmr.msra.gmra.mxu2 %vm998_vm5, %v2449_v11  ;;  %v1899_v11 = vpop.eup %1898 }
 0x941   :  { %1820 = vmatmul.msk.f32.gmra.mxu2 %vm998_vm5, %v2455_v13  ;;  %v977_v13 = vld [vmem:[%s2690_s29 + $0x18] sm:$0xff] }
 0x942   :  { %1392 = vmatpush.msrb.mxu2 %v977_v13 }
 0x944   :  { %1393 = vmatpush.msrb.mxu2 %v976_v44 }
 0x946   :  { %1394 = vmatpush.msrb.mxu2 %v975_v62 }
 0x948   :  { %1395 = vmatpush.msrb.mxu2 %v974_v61 }
 0x9bc   :  { %v1222_v29 = vpop.f32.mrf.mxu2 }
 0x9bd   :  { %v1242_v38 = vsub.f32 %v1222_v29, %v1240_v23  ;;  %v978_v23 = vld [vmem:[%s2699_s10] sm:$0x1] }
 0x9bf   :  { %1821 = vmatmul.msk.f32.vlgmr.msra.gmra.mxu3 %vm544_vm2, %v1242_v38 }
 0x9c4   :  { %v1225_v41 = vpop.f32.mrf.mxu2 }
 0x9c5   :  { %v1243_v43 = vsub.f32 %v1225_v41, %v1241_v26 }
 0x9c7   :  { %1822 = vmatmul.msk.f32.gmra.mxu3 %vm544_vm2, %v1243_v43 }
 0x9cf   :  { %1830 = vmatmul.msk.f32.vlgmr.msrb.gmra.mxu3 %vm329_vm8, %v1899_v11 }
 0xa42   :  { %v1267_v0 = vpop.f32.mrf.mxu3 }
 0xa43   :  { %v1273_v3 = vadd.f32 %v1267_v0, %v2512_v32  ;;  %v972_v32 = vld [vmem:[%s2692_s8 + $0x28] sm:$0xff] }
 0xa44   :  { %1321 = vmatpush.msra.mxu0 %v972_v32  ;;  %v1596_v32 = vld [vmem:[%s2700_s11 + $0x20] sm:$0x1] }
 0xa45   :  { %v1275_v8 = vmax.f32 %v1273_v3, 0.0 }
 0xa46   :  { %1322 = vmatpush.msra.mxu0 %v971_v47  ;;  %v1595_v47 = vld [vmem:[%s2700_s11 + $0x18] sm:$0xff] }
 0xa4a   :  { %v1270_v2 = vpop.f32.mrf.mxu3 }
 0xa4b   :  { %v1274_v5 = vadd.f32 %v1270_v2, %v2510_v27  ;;  %v970_v27 = vld [vmem:[%s2692_s8 + $0x18] sm:$0xff] }
 0xa4c   :  { %1323 = vmatpush.msra.mxu0 %v970_v27  ;;  %v1594_v27 = vld [vmem:[%s2700_s11 + $0x10] sm:$0xff] }
 0xa4d   :  { %v1276_v6 = vmax.f32 %v1274_v5, 0.0 }
 0xa4e   :  { %1324 = vmatpush.msra.mxu0 %v969_v48  ;;  %v1557_v48 = vld [vmem:[%s2701_s15] sm:$0x1] }
 0xa4f   :  { %1823 = vmatpush.msk.msra.mxu1 %vm1080_vm9, %v1276_v6  ;;  %vm1533_vm9 = vcmask 1043456  }
 0xa50   :  { %1325 = vmatpush.msra.mxu0 %v968_v50 }
 0xa51   :  { %1295 = vmatpush.msra.mxu1 %v1275_v8 }
 0xa52   :  { %1824 = vmatmul.msk.f32.vlgmr.msra.gmra.mxu1 %vm1076_vm13, %v2517_v34  ;;  %v1453_v45 = vpop.f32.mrf.mxu3  ;;  %v967_v34 = vld [vmem:[%s2692_s8] sm:$0xff]  ;;  %vm1509_vm13 = vcmask 27648  }
 0xa53   :  { %v1454_v46 = vadd.f32 %v1892_v10, %v1453_v45  ;;  %1326 = vmatpush.msra.mxu0 %v967_v34  ;;  %v1592_v34 = vld [vmem:[%s2700_s11] sm:$0xff] }
 0xa55   :  { %1832 = vmatpush.xpose.msk.msra.mxu2 %vm329_vm8, %v1454_v46  ;;  %1424 = vmatpush.msrb.mxu0 %v1402_v30  ;;  %v1628_v30 = vld [vmem:[%s2702_s16 + $0x18] sm:$0xff] }
 0xa57   :  { %1425 = vmatpush.msrb.mxu0 %v1401_v55  ;;  %v1585_v55 = vstv %s2703_s18 }
 0xacf   :  { %v1297_v51 = vpop.f32.mrf.mxu1 }
 0xad0   :  { %1301 = vrot.lane.b32.xlu0 %v1297_v51, %s1972_s0  ;;  %v1593_v51 = vld [vmem:[%s2700_s11 + $0x8] sm:$0xff] }
 0xb42   :  { %v1302_v58 = vpop.permute.xlu0 %1301 }
 0xb43   :  { %v1304_v53 = vsel %vm329_vm8, %v2439_v22, %v1302_v58  ;;  %v1901_v22 = vpop.eup %1900 }
 0xb44   :  { %1825 = vmatmul.msk.f32.vlgmr.msra.gmra.mxu0 %vm415_vm11, %v1304_v53  ;;  %v1363_v20 = vmul.f32 %v1901_v22, %v1335_v1  ;;  %vm1367_vm11 = vweird.f32 %v1335_v1  ;;  %vm1368_vm4 = vweird.f32 %v1901_v22  ;;  %v1627_v53 = vld [vmem:[%s2702_s16 + $0x10] sm:$0xff] }
 0xb46   :  { %v1364_v14 = vsub.f32 1.0, %v1363_v20  ;;  %v1655_v20 = vld [vmem:[%s2159_s19 + $0x8] sm:$0xff] }
 0xb48   :  { %v1365_v52 = vmul.f32 %v1901_v22, %v1364_v14  ;;  %v1654_v14 = vld [vmem:[%s2159_s19] sm:$0xff] }
 0xb4a   :  { %v1366_v28 = vadd.f32 %v1901_v22, %v1365_v52  ;;  %v1629_v52 = vld [vmem:[%s2154_s30] sm:$0x1] }
 0xb4c   :  { %1829 = vmatmul.msk.f32.vlgmr.msrb.gmra.mxu0 %vm329_vm8, %v1899_v11 }
 0xbc1   :  { %v1328_v54 = vpop.f32.mrf.mxu0 }
 0xbc2   :  { %v1329_v24 = vadd.f32 %v1893_v15, %v1328_v54  ;;  %v1626_v15 = vld [vmem:[%s2702_s16 + $0x8] sm:$0xff]  ;;  %v1625_v54 = vld [vmem:[%s2702_s16] sm:$0xff] }
 0xbc4   :  { %v1331_v39 = vmax.f32 %v1329_v24, 0.0  ;;  %v1657_v24 = vld [vmem:[%s2159_s19 + $0x18] sm:$0xff] }
 0xbc6   :  { %1826 = vmatpush.msk.msrb.mxu1 %vm1005_vm12, %v1331_v39  ;;  %vm1369_vm12 = vmor %vm1367_vm11, %vm1368_vm4  ;;  %v1597_v39 = vld [vmem:[%s2704_s22] sm:$0x1] }
 0xbc7   :  { %1827 = vmatmul.msk.f32.vlgmr.msrb.gmra.mxu1 %vm998_vm5, %v1802_v57  ;;  %v1370_v35 = vsel %vm1369_vm12, %v1901_v22, %v1366_v28  ;;  %vm1372_vm5 = vcmp.eq.f32.partialorder %v1371_v31, 8.507059e+37  ;;  %v1656_v22 = vld [vmem:[%s2159_s19 + $0x10] sm:$0xff]  ;;  %s1920_s19 = sshra.s32 %s1692_s28, 4  ;;  %s1921_s19 = int_to_ptr.hbm [resolvable:$true] %s1920_s19 }
 0xbc8   :  { %1476 = vmatpush.msra.mxu1 %v1457_v49  ;;  %v1375_v59 = vsel %vm1372_vm5, %v1374_v33, %v1370_v35  ;;  %v1658_v33 = vld [vmem:[%s2164_s24] sm:$0x1]  ;;  %s1922_s30 = scalar_lea.hbm %s1921_s19, 1  ;;  %p1925_p1 = scmp.lt.s32.totalorder %s1921_s19, %s2169_s4 }
 0xbc9   :  { %v1427_v12 = vpop.f32.mrf.mxu0  ;;  %p1923_p0 = scmp.ne.s32.totalorder %s1921_s19, %s1922_s30  ;;  %p1926_p2 = scmp.lt.s32.totalorder %s1924_s1, %s1922_s30 }
 0xbca   :  { %1477 = vmatpush.msra.mxu1 %v1456_v19  ;;  %v1428_v18 = vadd.f32 %v1894_v7, %v1427_v12 }
 0xbcb   :  { %p1927_p3 = por %p1926_p2, %p1925_p1 }
 0xbcc   :  { %1838 = vmatpush.msk.msrb.mxu1 %vm514_vm15, %v1596_v32 }
 0xbcd   :  { %p1928_p4 = pnand %p1927_p3, %p1923_p0 }
 0xbce   :  { %1616 = vmatpush.msrb.mxu1 %v1595_v47 }
 0xbcf   :  { %1831 = vmatmul.msk.f32.vlgmr.msra.gmra.mxu1 %vm329_vm8, %v1899_v11 }
 0xbd0   :  { %1617 = vmatpush.msrb.mxu1 %v1594_v27 }
 0xbd2   :  { %1618 = vmatpush.msrb.mxu1 %v1593_v51 }
 0xbd4   :  { %1619 = vmatpush.msrb.mxu1 %v1592_v34 }
 0xc44   :  { %v1359_v25 = vpop.f32.mrf.mxu1 }
 0xc45   :  { %v1376_v60 = vmul.f32 %v1375_v59, %v1359_v25 }
 0xc47   :  { %1828 = vmatmul.msk.f32.vlgmr.msrb.gmra.mxu2 %vm544_vm2, %v1376_v60 }
 0xc48   :  { %1645 = vmatpush.msrb.mxu2 %v1628_v30 }
 0xc4a   :  { %1646 = vmatpush.msrb.mxu2 %v1627_v53 }
 0xc4c   :  { %v1479_v16 = vpop.f32.mrf.mxu1  ;;  %1647 = vmatpush.msrb.mxu2 %v1626_v15 }
 0xc4d   :  { %v1480_v21 = vadd.f32 %v1895_v9, %v1479_v16 }
 0xc4e   :  { %1648 = vmatpush.msrb.mxu2 %v1625_v54 }
 0xc4f   :  { %1833 = vmatmul.msk.f32.vlgmr.msra.gmra.mxu2 %vm329_vm8, %v1428_v18  ;;  %1834 = vmatpush.msk.msra.mxu0 %vm1533_vm9, %v1480_v21 }
 0xc51   :  { %1674 = vmatpush.msrb.mxu0 %v1657_v24 }
 0xc53   :  { %1675 = vmatpush.msrb.mxu0 %v1656_v22 }
 0xc55   :  { %1676 = vmatpush.msrb.mxu0 %v1655_v20 }
 0xc57   :  { %1677 = vmatpush.msrb.mxu0 %v1654_v14 }
 0xcca   :  { %v1397_v26 = vpop.f32.mrf.mxu2 }
 0xccb   :  { %v1398_v36 = vadd.f32 %v1397_v26, %v978_v23 }
 0xccd   :  { %1902 = vtanh.f32 %v1398_v36 }
 0xcd2   :  { %v1505_v37 = vpop.f32.mrf.mxu2 }
 0xcd3   :  { %v1903_v17 = vpop.eup %1902  ;;  %v1508_v29 = vmul.f32 0.25, %v1505_v37 }
 0xcd4   :  { %1587 = vrot.lane.b32.xlu0 %v1903_v17, %s1972_s0 }
 0xcd5   :  { %v1510_v38 = vsel %vm1509_vm13, %v1508_v29, -inf }
 0xcd6   :  { %v1511_v42 = vrot.slane %v1510_v38, 4 }
 0xcd8   :  { %v1512_v40 = vmax.f32 %v1510_v38, %v1511_v42 }
 0xcda   :  { %v1513_v41 = vrot.slane %v1512_v40, 2 }
 0xcdc   :  { %v1514_v43 = vmax.f32 %v1512_v40, %v1513_v41 }
 0xcde   :  { %v1515_v11 = vrot.slane %v1514_v43, 1 }
 0xce0   :  { %v1516_v13 = vmax.f32 %v1514_v43, %v1515_v11 }
 0xce2   :  { %v1517_v44 = vsub.f32 %v1508_v29, %v1516_v13 }
 0xce4   :  { %v1518_v62 = vmul.f32 1.442695, %v1517_v44 }
 0xce6   :  { %1904 = vpow2.f32 %v1518_v62 }
 0xcec   :  { %v1905_v61 = vpop.eup %1904 }
 0xced   :  { %v1520_v0 = vsel %vm1509_vm13, %v1905_v61, 0.0 }
 0xcee   :  { %v1521_v2 = vrot.slane %v1520_v0, 4 }
 0xcf0   :  { %v1522_v3 = vadd.f32 %v1521_v2, %v1520_v0 }
 0xcf2   :  { %v1523_v5 = vrot.slane %v1522_v3, 2 }
 0xcf4   :  { %v1524_v6 = vadd.f32 %v1523_v5, %v1522_v3 }
 0xcf6   :  { %v1525_v8 = vrot.slane %v1524_v6, 1 }
 0xcf8   :  { %v1526_v10 = vadd.f32 %v1525_v8, %v1524_v6 }
 0xcfa   :  { %1906 = vrcp.f32 %v1526_v10 }
 0xd00   :  { %v1907_v45 = vpop.eup %1906 }
 0xd01   :  { %v1528_v46 = vmul.f32 %v1907_v45, %v1905_v61 }
 0xd03   :  { %1835 = vmatmul.msk.f32.vlgmr.msra.gmra.mxu0 %vm1529_vm0, %v1528_v46 }
 0xd46   :  { %v1588_v56 = vpop.permute.xlu0 %1587 }
 0xd80   :  { %v1554_v50 = vpop.f32.mrf.mxu0 }
 0xd81   :  { %1836 = vmatpush.msk.msra.mxu3 %vm1533_vm9, %v1554_v50 }
 0xd82   :  { %1837 = vmatmul.msk.f32.vlgmr.msra.gmra.mxu3 %vm1529_vm0, %v1557_v48 }
 0xe05   :  { %v1581_v57 = vpop.f32.mrf.mxu3 }
 0xe06   :  { %v1590_v63 = vsel %vm329_vm8, %v1581_v57, %v1588_v56  ;;  %vm1682_vm8 = vcmask 57344  }
 0xe07   :  { %v1591_v58 = vsel %vm544_vm2, %v1590_v63, %v1585_v55 }
 0xe08   :  { %1839 = vmatmul.msk.f32.vlgmr.msrb.gmra.mxu1 %vm924_vm10, %v1591_v58 }
 0xe85   :  { %v1621_v49 = vpop.f32.mrf.mxu1 }
 0xe86   :  { %v1622_v19 = vadd.f32 %v1621_v49, %v1597_v39 }
 0xe88   :  { %v1624_v1 = vmax.f32 %v1622_v19, 0.0 }
 0xe8a   :  { %1840 = vmatmul.msk.f32.vlgmr.msrb.gmra.mxu2 %vm544_vm2, %v1624_v1 }
 0xf0d   :  { %v1650_v4 = vpop.f32.mrf.mxu2 }
 0xf0e   :  { %v1651_v28 = vadd.f32 %v1650_v4, %v1629_v52 }
 0xf10   :  { %v1653_v31 = vmax.f32 %v1651_v28, 0.0 }
 0xf12   :  { %1841 = vmatmul.msk.f32.vlgmr.msrb.gmra.mxu0 %vm544_vm2, %v1653_v31 }
 0xf8f   :  { %v1679_v35 = vpop.f32.mrf.mxu0 }
 0xf90   :  { %v1680_v25 = vadd.f32 %v1679_v35, %v1658_v33 }
 0xf92   :  { %1683 = vst.msk [vmem:[#allocation3] sm:$0x1] %vm1682_vm8, %v1680_v25 }
 0xf93   :  { %1931 = shalt.err (!%p1928_p4)
}
 0xf94   :  { %1694 = dma.vmem_to_hbm [thread:$0]  %s1690_s26, 16, %s1692_s28, [#allocation4]  }
 0xf95   :  { %1932 = dma.done.wait [#allocation4], 16  }
 0xf96   :  { %1933 = vsyncadd [#allocation4], 4294967280 }
 0xf97   :  { %1699 = vsyncpa [#allocation4], 1 }

</bundles_post_ra>
